<compile_context>
chip_gen: v7x
topology: tpu7x:2x2x1
jax: 0.10.0
libtpu: 0.0.40
codegen_flags: <defaults>
</compile_context>

<pallas_src>
import functools
import math

import jax
import jax.numpy as jnp
from jax.experimental import pallas as pl
from jax.experimental.pallas import tpu as pltpu

_BN_EPS = 1e-5


# ---------------------------------------------------------------------------
# Fused Bottleneck kernel (one grid step == one image)
# ---------------------------------------------------------------------------

def _bottleneck_kernel(x_ref, xres_ref, mask_ref, w1_ref, w2_ref, w3_ref,
                       s1_ref, b1_ref, s2_ref, b2_ref, s3_ref, b3_ref,
                       *rest, stride, Gh, Gw, OH, OW, has_down):
    rest = list(rest)
    patch_ref = rest.pop()      # (OH*OW, C1) f32 scratch  (conv2 tap patch)
    a1_ref = rest.pop()         # (R, C1)     f32 scratch  (conv1 output, padded phase-major)
    o_ref = rest.pop()          # (1, OH*OW, C4) f32 output
    if has_down:
        wd_ref, sd_ref, bd_ref = rest

    f32 = jnp.float32
    bf16 = jnp.bfloat16
    s = stride
    GG = Gh * Gw
    M = OH * OW
    C1 = w2_ref.shape[-1]

    # ---- conv1 (1x1) + bn1 + relu over every padded, phase-major row -------
    a1 = jnp.dot(x_ref[0], w1_ref[...], preferred_element_type=f32)
    a1 = jnp.maximum(a1 * s1_ref[...] + b1_ref[...], 0.0)
    # Zero the conv2 zero-padding halo (bn bias would otherwise leak into it).
    a1_ref[...] = a1 * mask_ref[...]

    # ---- conv2 (3x3, stride, pad=1) + bn2 + relu ---------------------------
    # 9 accumulated MXU dots; each tap's (OH*OW, C1) patch is gathered from the
    # VMEM-resident conv1 output with static (compile-time) slices only.
    acc = jnp.zeros((M, C1), f32)
    for dy in range(3):
        for dx in range(3):
            phase = (dy % s) * s + (dx % s)
            base = phase * GG + (dy // s) * Gw + (dx // s)
            for oh in range(OH):                       # static slice copies
                st = base + oh * Gw
                patch_ref[oh * OW:(oh + 1) * OW, :] = a1_ref[st:st + OW, :]
            acc = acc + jnp.dot(patch_ref[...].astype(bf16),
                                w2_ref[3 * dy + dx],
                                preferred_element_type=f32)
    a2 = jnp.maximum(acc * s2_ref[...] + b2_ref[...], 0.0).astype(bf16)

    # ---- conv3 (1x1) + bn3 --------------------------------------------------
    y = jnp.dot(a2, w3_ref[...], preferred_element_type=f32)
    y = y * s3_ref[...] + b3_ref[...]

    # ---- residual (downsample 1x1 conv + bn, or identity) ------------------
    if has_down:
        r = jnp.dot(xres_ref[0], wd_ref[...], preferred_element_type=f32)
        r = r * sd_ref[...] + bd_ref[...]
    else:
        r = xres_ref[0].astype(f32)

    # ---- add + relu, lane-dense (C4 = 128-wide) store ----------------------
    o_ref[0] = jnp.maximum(y + r, 0.0)


# ---------------------------------------------------------------------------
# Wrapper: layout prep + pallas_call
# ---------------------------------------------------------------------------

def _phase_layout(x_nchw, stride):
    """NCHW -> padded, phase-major NHWC rows (B, s*s*Gh*Gw, Cin), plus halo mask."""
    B, Cin, H, W = x_nchw.shape
    s = stride
    OH = (H + 2 - 3) // s + 1
    OW = (W + 2 - 3) // s + 1
    Gh = -(-(H + 2) // s)
    Gw = -(-(W + 2) // s)
    Hp, Wp = Gh * s, Gw * s
    assert OH - 1 + 2 // s <= Gh - 1 and OW - 1 + 2 // s <= Gw - 1

    x = jnp.transpose(x_nchw, (0, 2, 3, 1))                       # NHWC
    xpad = jnp.pad(x, ((0, 0), (1, Hp - H - 1), (1, Wp - W - 1), (0, 0)))
    xph = xpad.reshape(B, Gh, s, Gw, s, Cin).transpose(0, 2, 4, 1, 3, 5)
    xflat = xph.reshape(B, s * s * Gh * Gw, Cin).astype(jnp.bfloat16)

    vh = (jnp.arange(Hp) >= 1) & (jnp.arange(Hp) <= H)
    vw = (jnp.arange(Wp) >= 1) & (jnp.arange(Wp) <= W)
    m = (vh[:, None] & vw[None, :]).astype(jnp.float32)           # (Hp, Wp)
    mask = m.reshape(Gh, s, Gw, s).transpose(1, 3, 0, 2).reshape(-1, 1)

    xres = x[:, ::s, ::s, :].reshape(B, OH * OW, Cin)             # residual feed
    return xflat, xres, mask, (Gh, Gw, OH, OW)


def bottleneck_forward(x_nchw, p, *, stride):
    B, Cin, H, W = x_nchw.shape
    has_down = "wd" in p
    xflat, xres, mask, (Gh, Gw, OH, OW) = _phase_layout(x_nchw, stride)
    xres = xres.astype(jnp.bfloat16 if has_down else jnp.float32)

    C1 = p["w1"].shape[-1]
    C4 = p["w3"].shape[-1]
    R = xflat.shape[1]
    M = OH * OW

    args = [xflat, xres, mask,
            p["w1"], p["w2"].reshape(9, C1, C1), p["w3"],
            p["bn1"][0].reshape(1, C1), p["bn1"][1].reshape(1, C1),
            p["bn2"][0].reshape(1, C1), p["bn2"][1].reshape(1, C1),
            p["bn3"][0].reshape(1, C4), p["bn3"][1].reshape(1, C4)]

    def full_spec(a):
        zeros = (0,) * a.ndim
        return pl.BlockSpec(a.shape, lambda b, _z=zeros: _z)

    in_specs = [pl.BlockSpec((1, R, Cin), lambda b: (b, 0, 0)),
                pl.BlockSpec((1, M, Cin), lambda b: (b, 0, 0))]
    in_specs += [full_spec(a) for a in args[2:]]

    if has_down:
        extra = [p["wd"], p["bnd"][0].reshape(1, C4), p["bnd"][1].reshape(1, C4)]
        args += extra
        in_specs += [full_spec(a) for a in extra]

    kern = functools.partial(_bottleneck_kernel, stride=stride, Gh=Gh, Gw=Gw,
                             OH=OH, OW=OW, has_down=has_down)

    flops = 2 * B * (R * Cin * C1 + 9 * M * C1 * C1 + M * C1 * C4
                     + (M * Cin * C4 if has_down else 0))
    bytes_accessed = int(sum(a.size * a.dtype.itemsize for a in args)
                         + B * M * C4 * 4)

    out = pl.pallas_call(
        kern,
        out_shape=jax.ShapeDtypeStruct((B, M, C4), jnp.float32),
        grid_spec=pltpu.PrefetchScalarGridSpec(
            num_scalar_prefetch=0,
            grid=(B,),                                  # >= 2 parallel steps (v7x megacore)
            in_specs=in_specs,
            out_specs=pl.BlockSpec((1, M, C4), lambda b: (b, 0, 0)),
            scratch_shapes=[
                pltpu.VMEM((R, C1), jnp.float32),       # conv1 output (VMEM-resident)
                pltpu.VMEM((M, C1), jnp.float32),       # conv2 tap patch
            ]),
        compiler_params=pltpu.CompilerParams(
            dimension_semantics=("parallel",),
            vmem_limit_bytes=32 * 1024 * 1024),         # explicit budget (uses ~1 MiB)
        cost_estimate=pl.CostEstimate(flops=flops, transcendentals=0,
                                      bytes_accessed=bytes_accessed),
    )(*args)

    y = out.reshape(B, OH, OW, C4)
    return jnp.transpose(y, (0, 3, 1, 2))               # NHWC -> NCHW
    # TODO(synk): for large feature maps, add a spatial row-tile grid axis so
    # the per-step VMEM footprint stays bounded (not needed at these shapes).


# ---------------------------------------------------------------------------
# Parameters (deterministic, matching the module's __init__ shapes & init)
# ---------------------------------------------------------------------------

def conv_weight(key, kh, kw, cin, cout):
    std = math.sqrt(2.0 / (kh * kw * cout))              # He-normal (ResNet init)
    w = std * jax.random.normal(key, (kh, kw, cin, cout), jnp.float32)
    return w.astype(jnp.bfloat16)


def fold_bn(c, gamma=1.0, beta=0.0, mean=0.0, var=1.0):
    # TODO(synk): training-mode BatchNorm (batch statistics) has no clean static
    # fold; BN is implemented in inference mode folded to per-channel scale/bias.
    inv = gamma / math.sqrt(var + _BN_EPS)
    scale = jnp.full((c,), inv, jnp.float32)
    bias = jnp.full((c,), beta - mean * inv, jnp.float32)
    return scale, bias


def make_bottleneck_params(key, inplanes, planes, stride):
    ks = jax.random.split(key, 4)
    p = {
        "w1": conv_weight(ks[0], 1, 1, inplanes, planes).reshape(inplanes, planes),
        "bn1": fold_bn(planes),
        "w2": conv_weight(ks[1], 3, 3, planes, planes),          # HWIO
        "bn2": fold_bn(planes),
        "w3": conv_weight(ks[2], 1, 1, planes, planes * 4).reshape(planes, planes * 4),
        "bn3": fold_bn(planes * 4),
    }
    if stride != 1 or inplanes != planes * 4:                    # downsample branch
        p["wd"] = conv_weight(ks[3], 1, 1, inplanes, planes * 4).reshape(
            inplanes, planes * 4)
        p["bnd"] = fold_bn(planes * 4)
    return p


# ---------------------------------------------------------------------------
# Pure-JAX reference (for a correctness sanity check)
# ---------------------------------------------------------------------------

def reference_forward(x_nchw, p, *, stride):
    x = jnp.transpose(x_nchw, (0, 2, 3, 1)).astype(jnp.float32)

    def conv(h, w_hwio, s, pad):
        return jax.lax.conv_general_dilated(
            h, w_hwio.astype(jnp.float32), (s, s), pad,
            dimension_numbers=("NHWC", "HWIO", "NHWC"),
            precision=jax.lax.Precision.HIGHEST)

    def bn(h, sb):
        return h * sb[0] + sb[1]

    Cin = x.shape[-1]
    C1 = p["w1"].shape[-1]
    C4 = p["w3"].shape[-1]
    out = jnp.maximum(bn(conv(x, p["w1"].reshape(1, 1, Cin, C1), 1, "VALID"),
                         p["bn1"]), 0.0)
    out = jnp.maximum(bn(conv(out, p["w2"], stride, [(1, 1), (1, 1)]),
                         p["bn2"]), 0.0)
    out = bn(conv(out, p["w3"].reshape(1, 1, C1, C4), 1, "VALID"), p["bn3"])
    if "wd" in p:
        res = bn(conv(x, p["wd"].reshape(1, 1, Cin, C4), stride, "VALID"), p["bnd"])
    else:
        res = x
    y = jnp.maximum(out + res, 0.0)
    return jnp.transpose(y, (0, 3, 1, 2))


if __name__ == "__main__":
    key = jax.random.PRNGKey(0)
    kp, kx = jax.random.split(key)

    # Small Bottleneck: inplanes=64, planes=32, stride=2 -> downsample branch present.
    inplanes, planes, stride = 64, 32, 2
    B, H, W = 2, 16, 16

    params = make_bottleneck_params(kp, inplanes, planes, stride)
    x = jax.random.normal(kx, (B, inplanes, H, W), jnp.float32)

    fwd = jax.jit(functools.partial(bottleneck_forward, stride=stride))
    y = jax.block_until_ready(fwd(x, params))

    assert y.shape == (B, planes * 4, H // stride, W // stride), y.shape
    assert bool(jnp.all(jnp.isfinite(y)))

    ref = reference_forward(x, params, stride=stride)
    err = float(jnp.max(jnp.abs(y - ref)))
    scale = float(jnp.max(jnp.abs(ref))) + 1e-6
    assert err <= 0.05 * scale, (err, scale)             # bf16-operand tolerance

    print("KERNEL_OK")
</pallas_src>

<mosaic_0001>
module attributes {stable_mosaic.version = 11 : i64} {
  func.func @_bottleneck_kernel(%arg0: i32, %arg1: memref<1x324x64xbf16, #tpu.memory_space<vmem>>, %arg2: memref<1x64x64xbf16, #tpu.memory_space<vmem>>, %arg3: memref<324x1xf32, #tpu.memory_space<vmem>>, %arg4: memref<64x32xbf16, #tpu.memory_space<vmem>>, %arg5: memref<9x32x32xbf16, #tpu.memory_space<vmem>>, %arg6: memref<32x128xbf16, #tpu.memory_space<vmem>>, %arg7: memref<1x32xf32, #tpu.memory_space<vmem>>, %arg8: memref<1x32xf32, #tpu.memory_space<vmem>>, %arg9: memref<1x32xf32, #tpu.memory_space<vmem>>, %arg10: memref<1x32xf32, #tpu.memory_space<vmem>>, %arg11: memref<1x128xf32, #tpu.memory_space<vmem>>, %arg12: memref<1x128xf32, #tpu.memory_space<vmem>>, %arg13: memref<64x128xbf16, #tpu.memory_space<vmem>>, %arg14: memref<1x128xf32, #tpu.memory_space<vmem>>, %arg15: memref<1x128xf32, #tpu.memory_space<vmem>>, %arg16: memref<1x64x128xf32, #tpu.memory_space<vmem>>, %arg17: memref<324x32xf32, #tpu.memory_space<vmem>>, %arg18: memref<64x32xf32, #tpu.memory_space<vmem>>) attributes {dimension_semantics = [#tpu.dimension_semantics<parallel>], iteration_bounds = array<i64: 2>, scalar_prefetch = 0 : i64, scratch_operands = 2 : i64, tpu.core_type = #tpu.core_type<tc>, window_params = [{transform_indices = @transform_0, window_bounds = array<i64: 1, 324, 64>}, {transform_indices = @transform_1, window_bounds = array<i64: 1, 64, 64>}, {pipeline_mode = #tpu.pipeline_mode<synchronous>, transform_indices = @transform_2, window_bounds = array<i64: 324, 1>}, {pipeline_mode = #tpu.pipeline_mode<synchronous>, transform_indices = @transform_3, window_bounds = array<i64: 64, 32>}, {pipeline_mode = #tpu.pipeline_mode<synchronous>, transform_indices = @transform_4, window_bounds = array<i64: 9, 32, 32>}, {pipeline_mode = #tpu.pipeline_mode<synchronous>, transform_indices = @transform_5, window_bounds = array<i64: 32, 128>}, {pipeline_mode = #tpu.pipeline_mode<synchronous>, transform_indices = @transform_6, window_bounds = array<i64: 1, 32>}, {pipeline_mode = #tpu.pipeline_mode<synchronous>, transform_indices = @transform_7, window_bounds = array<i64: 1, 32>}, {pipeline_mode = #tpu.pipeline_mode<synchronous>, transform_indices = @transform_8, window_bounds = array<i64: 1, 32>}, {pipeline_mode = #tpu.pipeline_mode<synchronous>, transform_indices = @transform_9, window_bounds = array<i64: 1, 32>}, {pipeline_mode = #tpu.pipeline_mode<synchronous>, transform_indices = @transform_10, window_bounds = array<i64: 1, 128>}, {pipeline_mode = #tpu.pipeline_mode<synchronous>, transform_indices = @transform_11, window_bounds = array<i64: 1, 128>}, {pipeline_mode = #tpu.pipeline_mode<synchronous>, transform_indices = @transform_12, window_bounds = array<i64: 64, 128>}, {pipeline_mode = #tpu.pipeline_mode<synchronous>, transform_indices = @transform_13, window_bounds = array<i64: 1, 128>}, {pipeline_mode = #tpu.pipeline_mode<synchronous>, transform_indices = @transform_14, window_bounds = array<i64: 1, 128>}, {transform_indices = @transform_15, window_bounds = array<i64: 1, 64, 128>}]} {
    %c0 = arith.constant 0 : index
    %c0_0 = arith.constant 0 : index
    %c0_1 = arith.constant 0 : index
    %0 = vector.load %arg1[%c0, %c0_0, %c0_1] : memref<1x324x64xbf16, #tpu.memory_space<vmem>>, vector<1x324x64xbf16>
    %1 = vector.shape_cast %0 : vector<1x324x64xbf16> to vector<324x64xbf16>
    %c0_2 = arith.constant 0 : index
    %c0_3 = arith.constant 0 : index
    %2 = vector.load %arg4[%c0_2, %c0_3] : memref<64x32xbf16, #tpu.memory_space<vmem>>, vector<64x32xbf16>
    %cst = arith.constant dense<0.000000e+00> : vector<324x32xf32>
    %3 = tpu.matmul %1, %2, %cst {dimension_numbers = #tpu.dot_dimension_numbers<[1], [0], [0], [1], [0, 0, 1, 1], [], []>} : vector<324x64xbf16>, vector<64x32xbf16>, vector<324x32xf32> -> vector<324x32xf32>
    %c0_4 = arith.constant 0 : index
    %c0_5 = arith.constant 0 : index
    %4 = vector.load %arg7[%c0_4, %c0_5] : memref<1x32xf32, #tpu.memory_space<vmem>>, vector<1x32xf32>
    %5 = vector.broadcast %4 : vector<1x32xf32> to vector<324x32xf32>
    %6 = arith.mulf %3, %5 : vector<324x32xf32>
    %c0_6 = arith.constant 0 : index
    %c0_7 = arith.constant 0 : index
    %7 = vector.load %arg8[%c0_6, %c0_7] : memref<1x32xf32, #tpu.memory_space<vmem>>, vector<1x32xf32>
    %8 = vector.broadcast %7 : vector<1x32xf32> to vector<324x32xf32>
    %9 = arith.addf %6, %8 : vector<324x32xf32>
    %cst_8 = arith.constant 0.000000e+00 : f32
    %10 = vector.broadcast %cst_8 : f32 to vector<324x32xf32>
    %11 = arith.maximumf %9, %10 : vector<324x32xf32>
    %c0_9 = arith.constant 0 : index
    %c0_10 = arith.constant 0 : index
    %12 = vector.load %arg3[%c0_9, %c0_10] : memref<324x1xf32, #tpu.memory_space<vmem>>, vector<324x1xf32>
    %13 = vector.broadcast %12 : vector<324x1xf32> to vector<324x32xf32>
    %14 = arith.mulf %11, %13 : vector<324x32xf32>
    %c0_11 = arith.constant 0 : index
    %c0_12 = arith.constant 0 : index
    %15 = vector.load %arg17[%c0_11, %c0_12] : memref<324x32xf32, #tpu.memory_space<vmem>>, vector<324x32xf32>
    tpu.vector_store %arg17[%c0_11, %c0_12], %14 {strides = array<i32>} : memref<324x32xf32, #tpu.memory_space<vmem>>, vector<324x32xf32>,
    %cst_13 = arith.constant 0.000000e+00 : f32
    %16 = vector.broadcast %cst_13 : f32 to vector<64x32xf32>
    %c0_14 = arith.constant 0 : index
    %c0_15 = arith.constant 0 : index
    %17 = vector.load %arg17[%c0_14, %c0_15] : memref<324x32xf32, #tpu.memory_space<vmem>>, vector<8x32xf32>
    %c0_16 = arith.constant 0 : index
    %c0_17 = arith.constant 0 : index
    %18 = vector.load %arg18[%c0_16, %c0_17] : memref<64x32xf32, #tpu.memory_space<vmem>>, vector<8x32xf32>
    tpu.vector_store %arg18[%c0_16, %c0_17], %17 {strides = array<i32>} : memref<64x32xf32, #tpu.memory_space<vmem>>, vector<8x32xf32>,
    %c9 = arith.constant 9 : index
    %c0_18 = arith.constant 0 : index
    %19 = vector.load %arg17[%c9, %c0_18] : memref<324x32xf32, #tpu.memory_space<vmem>>, vector<8x32xf32>
    %c8 = arith.constant 8 : index
    %c0_19 = arith.constant 0 : index
    %20 = vector.load %arg18[%c8, %c0_19] : memref<64x32xf32, #tpu.memory_space<vmem>>, vector<8x32xf32>
    tpu.vector_store %arg18[%c8, %c0_19], %19 {strides = array<i32>} : memref<64x32xf32, #tpu.memory_space<vmem>>, vector<8x32xf32>,
    %c18 = arith.constant 18 : index
    %c0_20 = arith.constant 0 : index
    %21 = vector.load %arg17[%c18, %c0_20] : memref<324x32xf32, #tpu.memory_space<vmem>>, vector<8x32xf32>
    %c16 = arith.constant 16 : index
    %c0_21 = arith.constant 0 : index
    %22 = vector.load %arg18[%c16, %c0_21] : memref<64x32xf32, #tpu.memory_space<vmem>>, vector<8x32xf32>
    tpu.vector_store %arg18[%c16, %c0_21], %21 {strides = array<i32>} : memref<64x32xf32, #tpu.memory_space<vmem>>, vector<8x32xf32>,
    %c27 = arith.constant 27 : index
    %c0_22 = arith.constant 0 : index
    %23 = vector.load %arg17[%c27, %c0_22] : memref<324x32xf32, #tpu.memory_space<vmem>>, vector<8x32xf32>
    %c24 = arith.constant 24 : index
    %c0_23 = arith.constant 0 : index
    %24 = vector.load %arg18[%c24, %c0_23] : memref<64x32xf32, #tpu.memory_space<vmem>>, vector<8x32xf32>
    tpu.vector_store %arg18[%c24, %c0_23], %23 {strides = array<i32>} : memref<64x32xf32, #tpu.memory_space<vmem>>, vector<8x32xf32>,
    %c36 = arith.constant 36 : index
    %c0_24 = arith.constant 0 : index
    %25 = vector.load %arg17[%c36, %c0_24] : memref<324x32xf32, #tpu.memory_space<vmem>>, vector<8x32xf32>
    %c32 = arith.constant 32 : index
    %c0_25 = arith.constant 0 : index
    %26 = vector.load %arg18[%c32, %c0_25] : memref<64x32xf32, #tpu.memory_space<vmem>>, vector<8x32xf32>
    tpu.vector_store %arg18[%c32, %c0_25], %25 {strides = array<i32>} : memref<64x32xf32, #tpu.memory_space<vmem>>, vector<8x32xf32>,
    %c45 = arith.constant 45 : index
    %c0_26 = arith.constant 0 : index
    %27 = vector.load %arg17[%c45, %c0_26] : memref<324x32xf32, #tpu.memory_space<vmem>>, vector<8x32xf32>
    %c40 = arith.constant 40 : index
    %c0_27 = arith.constant 0 : index
    %28 = vector.load %arg18[%c40, %c0_27] : memref<64x32xf32, #tpu.memory_space<vmem>>, vector<8x32xf32>
    tpu.vector_store %arg18[%c40, %c0_27], %27 {strides = array<i32>} : memref<64x32xf32, #tpu.memory_space<vmem>>, vector<8x32xf32>,
    %c54 = arith.constant 54 : index
    %c0_28 = arith.constant 0 : index
    %29 = vector.load %arg17[%c54, %c0_28] : memref<324x32xf32, #tpu.memory_space<vmem>>, vector<8x32xf32>
    %c48 = arith.constant 48 : index
    %c0_29 = arith.constant 0 : index
    %30 = vector.load %arg18[%c48, %c0_29] : memref<64x32xf32, #tpu.memory_space<vmem>>, vector<8x32xf32>
    tpu.vector_store %arg18[%c48, %c0_29], %29 {strides = array<i32>} : memref<64x32xf32, #tpu.memory_space<vmem>>, vector<8x32xf32>,
    %c63 = arith.constant 63 : index
    %c0_30 = arith.constant 0 : index
    %31 = vector.load %arg17[%c63, %c0_30] : memref<324x32xf32, #tpu.memory_space<vmem>>, vector<8x32xf32>
    %c56 = arith.constant 56 : index
    %c0_31 = arith.constant 0 : index
    %32 = vector.load %arg18[%c56, %c0_31] : memref<64x32xf32, #tpu.memory_space<vmem>>, vector<8x32xf32>
    tpu.vector_store %arg18[%c56, %c0_31], %31 {strides = array<i32>} : memref<64x32xf32, #tpu.memory_space<vmem>>, vector<8x32xf32>,
    %c0_32 = arith.constant 0 : index
    %c0_33 = arith.constant 0 : index
    %33 = vector.load %arg18[%c0_32, %c0_33] : memref<64x32xf32, #tpu.memory_space<vmem>>, vector<64x32xf32>
    %34 = arith.truncf %33 : vector<64x32xf32> to vector<64x32xbf16>
    %c0_34 = arith.constant 0 : index
    %c0_35 = arith.constant 0 : index
    %c0_36 = arith.constant 0 : index
    %35 = vector.load %arg5[%c0_34, %c0_35, %c0_36] : memref<9x32x32xbf16, #tpu.memory_space<vmem>>, vector<1x32x32xbf16>
    %36 = vector.shape_cast %35 : vector<1x32x32xbf16> to vector<32x32xbf16>
    %cst_37 = arith.constant dense<0.000000e+00> : vector<64x32xf32>
    %37 = tpu.matmul %34, %36, %cst_37 {dimension_numbers = #tpu.dot_dimension_numbers<[1], [0], [0], [1], [0, 0, 1, 1], [], []>} : vector<64x32xbf16>, vector<32x32xbf16>, vector<64x32xf32> -> vector<64x32xf32>
    %38 = arith.addf %16, %37 : vector<64x32xf32>
    %c81 = arith.constant 81 : index
    %c0_38 = arith.constant 0 : index
    %39 = vector.load %arg17[%c81, %c0_38] : memref<324x32xf32, #tpu.memory_space<vmem>>, vector<8x32xf32>
    %c0_39 = arith.constant 0 : index
    %c0_40 = arith.constant 0 : index
    %40 = vector.load %arg18[%c0_39, %c0_40] : memref<64x32xf32, #tpu.memory_space<vmem>>, vector<8x32xf32>
    tpu.vector_store %arg18[%c0_39, %c0_40], %39 {strides = array<i32>} : memref<64x32xf32, #tpu.memory_space<vmem>>, vector<8x32xf32>,
    %c90 = arith.constant 90 : index
    %c0_41 = arith.constant 0 : index
    %41 = vector.load %arg17[%c90, %c0_41] : memref<324x32xf32, #tpu.memory_space<vmem>>, vector<8x32xf32>
    %c8_42 = arith.constant 8 : index
    %c0_43 = arith.constant 0 : index
    %42 = vector.load %arg18[%c8_42, %c0_43] : memref<64x32xf32, #tpu.memory_space<vmem>>, vector<8x32xf32>
    tpu.vector_store %arg18[%c8_42, %c0_43], %41 {strides = array<i32>} : memref<64x32xf32, #tpu.memory_space<vmem>>, vector<8x32xf32>,
    %c99 = arith.constant 99 : index
    %c0_44 = arith.constant 0 : index
    %43 = vector.load %arg17[%c99, %c0_44] : memref<324x32xf32, #tpu.memory_space<vmem>>, vector<8x32xf32>
    %c16_45 = arith.constant 16 : index
    %c0_46 = arith.constant 0 : index
    %44 = vector.load %arg18[%c16_45, %c0_46] : memref<64x32xf32, #tpu.memory_space<vmem>>, vector<8x32xf32>
    tpu.vector_store %arg18[%c16_45, %c0_46], %43 {strides = array<i32>} : memref<64x32xf32, #tpu.memory_space<vmem>>, vector<8x32xf32>,
    %c108 = arith.constant 108 : index
    %c0_47 = arith.constant 0 : index
    %45 = vector.load %arg17[%c108, %c0_47] : memref<324x32xf32, #tpu.memory_space<vmem>>, vector<8x32xf32>
    %c24_48 = arith.constant 24 : index
    %c0_49 = arith.constant 0 : index
    %46 = vector.load %arg18[%c24_48, %c0_49] : memref<64x32xf32, #tpu.memory_space<vmem>>, vector<8x32xf32>
    tpu.vector_store %arg18[%c24_48, %c0_49], %45 {strides = array<i32>} : memref<64x32xf32, #tpu.memory_space<vmem>>, vector<8x32xf32>,
    %c117 = arith.constant 117 : index
    %c0_50 = arith.constant 0 : index
    %47 = vector.load %arg17[%c117, %c0_50] : memref<324x32xf32, #tpu.memory_space<vmem>>, vector<8x32xf32>
    %c32_51 = arith.constant 32 : index
    %c0_52 = arith.constant 0 : index
    %48 = vector.load %arg18[%c32_51, %c0_52] : memref<64x32xf32, #tpu.memory_space<vmem>>, vector<8x32xf32>
    tpu.vector_store %arg18[%c32_51, %c0_52], %47 {strides = array<i32>} : memref<64x32xf32, #tpu.memory_space<vmem>>, vector<8x32xf32>,
    %c126 = arith.constant 126 : index
    %c0_53 = arith.constant 0 : index
    %49 = vector.load %arg17[%c126, %c0_53] : memref<324x32xf32, #tpu.memory_space<vmem>>, vector<8x32xf32>
    %c40_54 = arith.constant 40 : index
    %c0_55 = arith.constant 0 : index
    %50 = vector.load %arg18[%c40_54, %c0_55] : memref<64x32xf32, #tpu.memory_space<vmem>>, vector<8x32xf32>
    tpu.vector_store %arg18[%c40_54, %c0_55], %49 {strides = array<i32>} : memref<64x32xf32, #tpu.memory_space<vmem>>, vector<8x32xf32>,
    %c135 = arith.constant 135 : index
    %c0_56 = arith.constant 0 : index
    %51 = vector.load %arg17[%c135, %c0_56] : memref<324x32xf32, #tpu.memory_space<vmem>>, vector<8x32xf32>
    %c48_57 = arith.constant 48 : index
    %c0_58 = arith.constant 0 : index
    %52 = vector.load %arg18[%c48_57, %c0_58] : memref<64x32xf32, #tpu.memory_space<vmem>>, vector<8x32xf32>
    tpu.vector_store %arg18[%c48_57, %c0_58], %51 {strides = array<i32>} : memref<64x32xf32, #tpu.memory_space<vmem>>, vector<8x32xf32>,
    %c144 = arith.constant 144 : index
    %c0_59 = arith.constant 0 : index
    %53 = vector.load %arg17[%c144, %c0_59] : memref<324x32xf32, #tpu.memory_space<vmem>>, vector<8x32xf32>
    %c56_60 = arith.constant 56 : index
    %c0_61 = arith.constant 0 : index
    %54 = vector.load %arg18[%c56_60, %c0_61] : memref<64x32xf32, #tpu.memory_space<vmem>>, vector<8x32xf32>
    tpu.vector_store %arg18[%c56_60, %c0_61], %53 {strides = array<i32>} : memref<64x32xf32, #tpu.memory_space<vmem>>, vector<8x32xf32>,
    %c0_62 = arith.constant 0 : index
    %c0_63 = arith.constant 0 : index
    %55 = vector.load %arg18[%c0_62, %c0_63] : memref<64x32xf32, #tpu.memory_space<vmem>>, vector<64x32xf32>
    %56 = arith.truncf %55 : vector<64x32xf32> to vector<64x32xbf16>
    %c1 = arith.constant 1 : index
    %c0_64 = arith.constant 0 : index
    %c0_65 = arith.constant 0 : index
    %57 = vector.load %arg5[%c1, %c0_64, %c0_65] : memref<9x32x32xbf16, #tpu.memory_space<vmem>>, vector<1x32x32xbf16>
    %58 = vector.shape_cast %57 : vector<1x32x32xbf16> to vector<32x32xbf16>
    %cst_66 = arith.constant dense<0.000000e+00> : vector<64x32xf32>
    %59 = tpu.matmul %56, %58, %cst_66 {dimension_numbers = #tpu.dot_dimension_numbers<[1], [0], [0], [1], [0, 0, 1, 1], [], []>} : vector<64x32xbf16>, vector<32x32xbf16>, vector<64x32xf32> -> vector<64x32xf32>
    %60 = arith.addf %38, %59 : vector<64x32xf32>
    %c1_67 = arith.constant 1 : index
    %c0_68 = arith.constant 0 : index
    %61 = vector.load %arg17[%c1_67, %c0_68] : memref<324x32xf32, #tpu.memory_space<vmem>>, vector<8x32xf32>
    %c0_69 = arith.constant 0 : index
    %c0_70 = arith.constant 0 : index
    %62 = vector.load %arg18[%c0_69, %c0_70] : memref<64x32xf32, #tpu.memory_space<vmem>>, vector<8x32xf32>
    tpu.vector_store %arg18[%c0_69, %c0_70], %61 {strides = array<i32>} : memref<64x32xf32, #tpu.memory_space<vmem>>, vector<8x32xf32>,
    %c10 = arith.constant 10 : index
    %c0_71 = arith.constant 0 : index
    %63 = vector.load %arg17[%c10, %c0_71] : memref<324x32xf32, #tpu.memory_space<vmem>>, vector<8x32xf32>
    %c8_72 = arith.constant 8 : index
    %c0_73 = arith.constant 0 : index
    %64 = vector.load %arg18[%c8_72, %c0_73] : memref<64x32xf32, #tpu.memory_space<vmem>>, vector<8x32xf32>
    tpu.vector_store %arg18[%c8_72, %c0_73], %63 {strides = array<i32>} : memref<64x32xf32, #tpu.memory_space<vmem>>, vector<8x32xf32>,
    %c19 = arith.constant 19 : index
    %c0_74 = arith.constant 0 : index
    %65 = vector.load %arg17[%c19, %c0_74] : memref<324x32xf32, #tpu.memory_space<vmem>>, vector<8x32xf32>
    %c16_75 = arith.constant 16 : index
    %c0_76 = arith.constant 0 : index
    %66 = vector.load %arg18[%c16_75, %c0_76] : memref<64x32xf32, #tpu.memory_space<vmem>>, vector<8x32xf32>
    tpu.vector_store %arg18[%c16_75, %c0_76], %65 {strides = array<i32>} : memref<64x32xf32, #tpu.memory_space<vmem>>, vector<8x32xf32>,
    %c28 = arith.constant 28 : index
    %c0_77 = arith.constant 0 : index
    %67 = vector.load %arg17[%c28, %c0_77] : memref<324x32xf32, #tpu.memory_space<vmem>>, vector<8x32xf32>
    %c24_78 = arith.constant 24 : index
    %c0_79 = arith.constant 0 : index
    %68 = vector.load %arg18[%c24_78, %c0_79] : memref<64x32xf32, #tpu.memory_space<vmem>>, vector<8x32xf32>
    tpu.vector_store %arg18[%c24_78, %c0_79], %67 {strides = array<i32>} : memref<64x32xf32, #tpu.memory_space<vmem>>, vector<8x32xf32>,
    %c37 = arith.constant 37 : index
    %c0_80 = arith.constant 0 : index
    %69 = vector.load %arg17[%c37, %c0_80] : memref<324x32xf32, #tpu.memory_space<vmem>>, vector<8x32xf32>
    %c32_81 = arith.constant 32 : index
    %c0_82 = arith.constant 0 : index
    %70 = vector.load %arg18[%c32_81, %c0_82] : memref<64x32xf32, #tpu.memory_space<vmem>>, vector<8x32xf32>
    tpu.vector_store %arg18[%c32_81, %c0_82], %69 {strides = array<i32>} : memref<64x32xf32, #tpu.memory_space<vmem>>, vector<8x32xf32>,
    %c46 = arith.constant 46 : index
    %c0_83 = arith.constant 0 : index
    %71 = vector.load %arg17[%c46, %c0_83] : memref<324x32xf32, #tpu.memory_space<vmem>>, vector<8x32xf32>
    %c40_84 = arith.constant 40 : index
    %c0_85 = arith.constant 0 : index
    %72 = vector.load %arg18[%c40_84, %c0_85] : memref<64x32xf32, #tpu.memory_space<vmem>>, vector<8x32xf32>
    tpu.vector_store %arg18[%c40_84, %c0_85], %71 {strides = array<i32>} : memref<64x32xf32, #tpu.memory_space<vmem>>, vector<8x32xf32>,
    %c55 = arith.constant 55 : index
    %c0_86 = arith.constant 0 : index
    %73 = vector.load %arg17[%c55, %c0_86] : memref<324x32xf32, #tpu.memory_space<vmem>>, vector<8x32xf32>
    %c48_87 = arith.constant 48 : index
    %c0_88 = arith.constant 0 : index
    %74 = vector.load %arg18[%c48_87, %c0_88] : memref<64x32xf32, #tpu.memory_space<vmem>>, vector<8x32xf32>
    tpu.vector_store %arg18[%c48_87, %c0_88], %73 {strides = array<i32>} : memref<64x32xf32, #tpu.memory_space<vmem>>, vector<8x32xf32>,
    %c64 = arith.constant 64 : index
    %c0_89 = arith.constant 0 : index
    %75 = vector.load %arg17[%c64, %c0_89] : memref<324x32xf32, #tpu.memory_space<vmem>>, vector<8x32xf32>
    %c56_90 = arith.constant 56 : index
    %c0_91 = arith.constant 0 : index
    %76 = vector.load %arg18[%c56_90, %c0_91] : memref<64x32xf32, #tpu.memory_space<vmem>>, vector<8x32xf32>
    tpu.vector_store %arg18[%c56_90, %c0_91], %75 {strides = array<i32>} : memref<64x32xf32, #tpu.memory_space<vmem>>, vector<8x32xf32>,
    %c0_92 = arith.constant 0 : index
    %c0_93 = arith.constant 0 : index
    %77 = vector.load %arg18[%c0_92, %c0_93] : memref<64x32xf32, #tpu.memory_space<vmem>>, vector<64x32xf32>
    %78 = arith.truncf %77 : vector<64x32xf32> to vector<64x32xbf16>
    %c2 = arith.constant 2 : index
    %c0_94 = arith.constant 0 : index
    %c0_95 = arith.constant 0 : index
    %79 = vector.load %arg5[%c2, %c0_94, %c0_95] : memref<9x32x32xbf16, #tpu.memory_space<vmem>>, vector<1x32x32xbf16>
    %80 = vector.shape_cast %79 : vector<1x32x32xbf16> to vector<32x32xbf16>
    %cst_96 = arith.constant dense<0.000000e+00> : vector<64x32xf32>
    %81 = tpu.matmul %78, %80, %cst_96 {dimension_numbers = #tpu.dot_dimension_numbers<[1], [0], [0], [1], [0, 0, 1, 1], [], []>} : vector<64x32xbf16>, vector<32x32xbf16>, vector<64x32xf32> -> vector<64x32xf32>
    %82 = arith.addf %60, %81 : vector<64x32xf32>
    %c162 = arith.constant 162 : index
    %c0_97 = arith.constant 0 : index
    %83 = vector.load %arg17[%c162, %c0_97] : memref<324x32xf32, #tpu.memory_space<vmem>>, vector<8x32xf32>
    %c0_98 = arith.constant 0 : index
    %c0_99 = arith.constant 0 : index
    %84 = vector.load %arg18[%c0_98, %c0_99] : memref<64x32xf32, #tpu.memory_space<vmem>>, vector<8x32xf32>
    tpu.vector_store %arg18[%c0_98, %c0_99], %83 {strides = array<i32>} : memref<64x32xf32, #tpu.memory_space<vmem>>, vector<8x32xf32>,
    %c171 = arith.constant 171 : index
    %c0_100 = arith.constant 0 : index
    %85 = vector.load %arg17[%c171, %c0_100] : memref<324x32xf32, #tpu.memory_space<vmem>>, vector<8x32xf32>
    %c8_101 = arith.constant 8 : index
    %c0_102 = arith.constant 0 : index
    %86 = vector.load %arg18[%c8_101, %c0_102] : memref<64x32xf32, #tpu.memory_space<vmem>>, vector<8x32xf32>
    tpu.vector_store %arg18[%c8_101, %c0_102], %85 {strides = array<i32>} : memref<64x32xf32, #tpu.memory_space<vmem>>, vector<8x32xf32>,
    %c180 = arith.constant 180 : index
    %c0_103 = arith.constant 0 : index
    %87 = vector.load %arg17[%c180, %c0_103] : memref<324x32xf32, #tpu.memory_space<vmem>>, vector<8x32xf32>
    %c16_104 = arith.constant 16 : index
    %c0_105 = arith.constant 0 : index
    %88 = vector.load %arg18[%c16_104, %c0_105] : memref<64x32xf32, #tpu.memory_space<vmem>>, vector<8x32xf32>
    tpu.vector_store %arg18[%c16_104, %c0_105], %87 {strides = array<i32>} : memref<64x32xf32, #tpu.memory_space<vmem>>, vector<8x32xf32>,
    %c189 = arith.constant 189 : index
    %c0_106 = arith.constant 0 : index
    %89 = vector.load %arg17[%c189, %c0_106] : memref<324x32xf32, #tpu.memory_space<vmem>>, vector<8x32xf32>
    %c24_107 = arith.constant 24 : index
    %c0_108 = arith.constant 0 : index
    %90 = vector.load %arg18[%c24_107, %c0_108] : memref<64x32xf32, #tpu.memory_space<vmem>>, vector<8x32xf32>
    tpu.vector_store %arg18[%c24_107, %c0_108], %89 {strides = array<i32>} : memref<64x32xf32, #tpu.memory_space<vmem>>, vector<8x32xf32>,
    %c198 = arith.constant 198 : index
    %c0_109 = arith.constant 0 : index
    %91 = vector.load %arg17[%c198, %c0_109] : memref<324x32xf32, #tpu.memory_space<vmem>>, vector<8x32xf32>
    %c32_110 = arith.constant 32 : index
    %c0_111 = arith.constant 0 : index
    %92 = vector.load %arg18[%c32_110, %c0_111] : memref<64x32xf32, #tpu.memory_space<vmem>>, vector<8x32xf32>
    tpu.vector_store %arg18[%c32_110, %c0_111], %91 {strides = array<i32>} : memref<64x32xf32, #tpu.memory_space<vmem>>, vector<8x32xf32>,
    %c207 = arith.constant 207 : index
    %c0_112 = arith.constant 0 : index
    %93 = vector.load %arg17[%c207, %c0_112] : memref<324x32xf32, #tpu.memory_space<vmem>>, vector<8x32xf32>
    %c40_113 = arith.constant 40 : index
    %c0_114 = arith.constant 0 : index
    %94 = vector.load %arg18[%c40_113, %c0_114] : memref<64x32xf32, #tpu.memory_space<vmem>>, vector<8x32xf32>
    tpu.vector_store %arg18[%c40_113, %c0_114], %93 {strides = array<i32>} : memref<64x32xf32, #tpu.memory_space<vmem>>, vector<8x32xf32>,
    %c216 = arith.constant 216 : index
    %c0_115 = arith.constant 0 : index
    %95 = vector.load %arg17[%c216, %c0_115] : memref<324x32xf32, #tpu.memory_space<vmem>>, vector<8x32xf32>
    %c48_116 = arith.constant 48 : index
    %c0_117 = arith.constant 0 : index
    %96 = vector.load %arg18[%c48_116, %c0_117] : memref<64x32xf32, #tpu.memory_space<vmem>>, vector<8x32xf32>
    tpu.vector_store %arg18[%c48_116, %c0_117], %95 {strides = array<i32>} : memref<64x32xf32, #tpu.memory_space<vmem>>, vector<8x32xf32>,
    %c225 = arith.constant 225 : index
    %c0_118 = arith.constant 0 : index
    %97 = vector.load %arg17[%c225, %c0_118] : memref<324x32xf32, #tpu.memory_space<vmem>>, vector<8x32xf32>
    %c56_119 = arith.constant 56 : index
    %c0_120 = arith.constant 0 : index
    %98 = vector.load %arg18[%c56_119, %c0_120] : memref<64x32xf32, #tpu.memory_space<vmem>>, vector<8x32xf32>
    tpu.vector_store %arg18[%c56_119, %c0_120], %97 {strides = array<i32>} : memref<64x32xf32, #tpu.memory_space<vmem>>, vector<8x32xf32>,
    %c0_121 = arith.constant 0 : index
    %c0_122 = arith.constant 0 : index
    %99 = vector.load %arg18[%c0_121, %c0_122] : memref<64x32xf32, #tpu.memory_space<vmem>>, vector<64x32xf32>
    %100 = arith.truncf %99 : vector<64x32xf32> to vector<64x32xbf16>
    %c3 = arith.constant 3 : index
    %c0_123 = arith.constant 0 : index
    %c0_124 = arith.constant 0 : index
    %101 = vector.load %arg5[%c3, %c0_123, %c0_124] : memref<9x32x32xbf16, #tpu.memory_space<vmem>>, vector<1x32x32xbf16>
    %102 = vector.shape_cast %101 : vector<1x32x32xbf16> to vector<32x32xbf16>
    %cst_125 = arith.constant dense<0.000000e+00> : vector<64x32xf32>
    %103 = tpu.matmul %100, %102, %cst_125 {dimension_numbers = #tpu.dot_dimension_numbers<[1], [0], [0], [1], [0, 0, 1, 1], [], []>} : vector<64x32xbf16>, vector<32x32xbf16>, vector<64x32xf32> -> vector<64x32xf32>
    %104 = arith.addf %82, %103 : vector<64x32xf32>
    %c243 = arith.constant 243 : index
    %c0_126 = arith.constant 0 : index
    %105 = vector.load %arg17[%c243, %c0_126] : memref<324x32xf32, #tpu.memory_space<vmem>>, vector<8x32xf32>
    %c0_127 = arith.constant 0 : index
    %c0_128 = arith.constant 0 : index
    %106 = vector.load %arg18[%c0_127, %c0_128] : memref<64x32xf32, #tpu.memory_space<vmem>>, vector<8x32xf32>
    tpu.vector_store %arg18[%c0_127, %c0_128], %105 {strides = array<i32>} : memref<64x32xf32, #tpu.memory_space<vmem>>, vector<8x32xf32>,
    %c252 = arith.constant 252 : index
    %c0_129 = arith.constant 0 : index
    %107 = vector.load %arg17[%c252, %c0_129] : memref<324x32xf32, #tpu.memory_space<vmem>>, vector<8x32xf32>
    %c8_130 = arith.constant 8 : index
    %c0_131 = arith.constant 0 : index
    %108 = vector.load %arg18[%c8_130, %c0_131] : memref<64x32xf32, #tpu.memory_space<vmem>>, vector<8x32xf32>
    tpu.vector_store %arg18[%c8_130, %c0_131], %107 {strides = array<i32>} : memref<64x32xf32, #tpu.memory_space<vmem>>, vector<8x32xf32>,
    %c261 = arith.constant 261 : index
    %c0_132 = arith.constant 0 : index
    %109 = vector.load %arg17[%c261, %c0_132] : memref<324x32xf32, #tpu.memory_space<vmem>>, vector<8x32xf32>
    %c16_133 = arith.constant 16 : index
    %c0_134 = arith.constant 0 : index
    %110 = vector.load %arg18[%c16_133, %c0_134] : memref<64x32xf32, #tpu.memory_space<vmem>>, vector<8x32xf32>
    tpu.vector_store %arg18[%c16_133, %c0_134], %109 {strides = array<i32>} : memref<64x32xf32, #tpu.memory_space<vmem>>, vector<8x32xf32>,
    %c270 = arith.constant 270 : index
    %c0_135 = arith.constant 0 : index
    %111 = vector.load %arg17[%c270, %c0_135] : memref<324x32xf32, #tpu.memory_space<vmem>>, vector<8x32xf32>
    %c24_136 = arith.constant 24 : index
    %c0_137 = arith.constant 0 : index
    %112 = vector.load %arg18[%c24_136, %c0_137] : memref<64x32xf32, #tpu.memory_space<vmem>>, vector<8x32xf32>
    tpu.vector_store %arg18[%c24_136, %c0_137], %111 {strides = array<i32>} : memref<64x32xf32, #tpu.memory_space<vmem>>, vector<8x32xf32>,
    %c279 = arith.constant 279 : index
    %c0_138 = arith.constant 0 : index
    %113 = vector.load %arg17[%c279, %c0_138] : memref<324x32xf32, #tpu.memory_space<vmem>>, vector<8x32xf32>
    %c32_139 = arith.constant 32 : index
    %c0_140 = arith.constant 0 : index
    %114 = vector.load %arg18[%c32_139, %c0_140] : memref<64x32xf32, #tpu.memory_space<vmem>>, vector<8x32xf32>
    tpu.vector_store %arg18[%c32_139, %c0_140], %113 {strides = array<i32>} : memref<64x32xf32, #tpu.memory_space<vmem>>, vector<8x32xf32>,
    %c288 = arith.constant 288 : index
    %c0_141 = arith.constant 0 : index
    %115 = vector.load %arg17[%c288, %c0_141] : memref<324x32xf32, #tpu.memory_space<vmem>>, vector<8x32xf32>
    %c40_142 = arith.constant 40 : index
    %c0_143 = arith.constant 0 : index
    %116 = vector.load %arg18[%c40_142, %c0_143] : memref<64x32xf32, #tpu.memory_space<vmem>>, vector<8x32xf32>
    tpu.vector_store %arg18[%c40_142, %c0_143], %115 {strides = array<i32>} : memref<64x32xf32, #tpu.memory_space<vmem>>, vector<8x32xf32>,
    %c297 = arith.constant 297 : index
    %c0_144 = arith.constant 0 : index
    %117 = vector.load %arg17[%c297, %c0_144] : memref<324x32xf32, #tpu.memory_space<vmem>>, vector<8x32xf32>
    %c48_145 = arith.constant 48 : index
    %c0_146 = arith.constant 0 : index
    %118 = vector.load %arg18[%c48_145, %c0_146] : memref<64x32xf32, #tpu.memory_space<vmem>>, vector<8x32xf32>
    tpu.vector_store %arg18[%c48_145, %c0_146], %117 {strides = array<i32>} : memref<64x32xf32, #tpu.memory_space<vmem>>, vector<8x32xf32>,
    %c306 = arith.constant 306 : index
    %c0_147 = arith.constant 0 : index
    %119 = vector.load %arg17[%c306, %c0_147] : memref<324x32xf32, #tpu.memory_space<vmem>>, vector<8x32xf32>
    %c56_148 = arith.constant 56 : index
    %c0_149 = arith.constant 0 : index
    %120 = vector.load %arg18[%c56_148, %c0_149] : memref<64x32xf32, #tpu.memory_space<vmem>>, vector<8x32xf32>
    tpu.vector_store %arg18[%c56_148, %c0_149], %119 {strides = array<i32>} : memref<64x32xf32, #tpu.memory_space<vmem>>, vector<8x32xf32>,
    %c0_150 = arith.constant 0 : index
    %c0_151 = arith.constant 0 : index
    %121 = vector.load %arg18[%c0_150, %c0_151] : memref<64x32xf32, #tpu.memory_space<vmem>>, vector<64x32xf32>
    %122 = arith.truncf %121 : vector<64x32xf32> to vector<64x32xbf16>
    %c4 = arith.constant 4 : index
    %c0_152 = arith.constant 0 : index
    %c0_153 = arith.constant 0 : index
    %123 = vector.load %arg5[%c4, %c0_152, %c0_153] : memref<9x32x32xbf16, #tpu.memory_space<vmem>>, vector<1x32x32xbf16>
    %124 = vector.shape_cast %123 : vector<1x32x32xbf16> to vector<32x32xbf16>
    %cst_154 = arith.constant dense<0.000000e+00> : vector<64x32xf32>
    %125 = tpu.matmul %122, %124, %cst_154 {dimension_numbers = #tpu.dot_dimension_numbers<[1], [0], [0], [1], [0, 0, 1, 1], [], []>} : vector<64x32xbf16>, vector<32x32xbf16>, vector<64x32xf32> -> vector<64x32xf32>
    %126 = arith.addf %104, %125 : vector<64x32xf32>
    %c163 = arith.constant 163 : index
    %c0_155 = arith.constant 0 : index
    %127 = vector.load %arg17[%c163, %c0_155] : memref<324x32xf32, #tpu.memory_space<vmem>>, vector<8x32xf32>
    %c0_156 = arith.constant 0 : index
    %c0_157 = arith.constant 0 : index
    %128 = vector.load %arg18[%c0_156, %c0_157] : memref<64x32xf32, #tpu.memory_space<vmem>>, vector<8x32xf32>
    tpu.vector_store %arg18[%c0_156, %c0_157], %127 {strides = array<i32>} : memref<64x32xf32, #tpu.memory_space<vmem>>, vector<8x32xf32>,
    %c172 = arith.constant 172 : index
    %c0_158 = arith.constant 0 : index
    %129 = vector.load %arg17[%c172, %c0_158] : memref<324x32xf32, #tpu.memory_space<vmem>>, vector<8x32xf32>
    %c8_159 = arith.constant 8 : index
    %c0_160 = arith.constant 0 : index
    %130 = vector.load %arg18[%c8_159, %c0_160] : memref<64x32xf32, #tpu.memory_space<vmem>>, vector<8x32xf32>
    tpu.vector_store %arg18[%c8_159, %c0_160], %129 {strides = array<i32>} : memref<64x32xf32, #tpu.memory_space<vmem>>, vector<8x32xf32>,
    %c181 = arith.constant 181 : index
    %c0_161 = arith.constant 0 : index
    %131 = vector.load %arg17[%c181, %c0_161] : memref<324x32xf32, #tpu.memory_space<vmem>>, vector<8x32xf32>
    %c16_162 = arith.constant 16 : index
    %c0_163 = arith.constant 0 : index
    %132 = vector.load %arg18[%c16_162, %c0_163] : memref<64x32xf32, #tpu.memory_space<vmem>>, vector<8x32xf32>
    tpu.vector_store %arg18[%c16_162, %c0_163], %131 {strides = array<i32>} : memref<64x32xf32, #tpu.memory_space<vmem>>, vector<8x32xf32>,
    %c190 = arith.constant 190 : index
    %c0_164 = arith.constant 0 : index
    %133 = vector.load %arg17[%c190, %c0_164] : memref<324x32xf32, #tpu.memory_space<vmem>>, vector<8x32xf32>
    %c24_165 = arith.constant 24 : index
    %c0_166 = arith.constant 0 : index
    %134 = vector.load %arg18[%c24_165, %c0_166] : memref<64x32xf32, #tpu.memory_space<vmem>>, vector<8x32xf32>
    tpu.vector_store %arg18[%c24_165, %c0_166], %133 {strides = array<i32>} : memref<64x32xf32, #tpu.memory_space<vmem>>, vector<8x32xf32>,
    %c199 = arith.constant 199 : index
    %c0_167 = arith.constant 0 : index
    %135 = vector.load %arg17[%c199, %c0_167] : memref<324x32xf32, #tpu.memory_space<vmem>>, vector<8x32xf32>
    %c32_168 = arith.constant 32 : index
    %c0_169 = arith.constant 0 : index
    %136 = vector.load %arg18[%c32_168, %c0_169] : memref<64x32xf32, #tpu.memory_space<vmem>>, vector<8x32xf32>
    tpu.vector_store %arg18[%c32_168, %c0_169], %135 {strides = array<i32>} : memref<64x32xf32, #tpu.memory_space<vmem>>, vector<8x32xf32>,
    %c208 = arith.constant 208 : index
    %c0_170 = arith.constant 0 : index
    %137 = vector.load %arg17[%c208, %c0_170] : memref<324x32xf32, #tpu.memory_space<vmem>>, vector<8x32xf32>
    %c40_171 = arith.constant 40 : index
    %c0_172 = arith.constant 0 : index
    %138 = vector.load %arg18[%c40_171, %c0_172] : memref<64x32xf32, #tpu.memory_space<vmem>>, vector<8x32xf32>
    tpu.vector_store %arg18[%c40_171, %c0_172], %137 {strides = array<i32>} : memref<64x32xf32, #tpu.memory_space<vmem>>, vector<8x32xf32>,
    %c217 = arith.constant 217 : index
    %c0_173 = arith.constant 0 : index
    %139 = vector.load %arg17[%c217, %c0_173] : memref<324x32xf32, #tpu.memory_space<vmem>>, vector<8x32xf32>
    %c48_174 = arith.constant 48 : index
    %c0_175 = arith.constant 0 : index
    %140 = vector.load %arg18[%c48_174, %c0_175] : memref<64x32xf32, #tpu.memory_space<vmem>>, vector<8x32xf32>
    tpu.vector_store %arg18[%c48_174, %c0_175], %139 {strides = array<i32>} : memref<64x32xf32, #tpu.memory_space<vmem>>, vector<8x32xf32>,
    %c226 = arith.constant 226 : index
    %c0_176 = arith.constant 0 : index
    %141 = vector.load %arg17[%c226, %c0_176] : memref<324x32xf32, #tpu.memory_space<vmem>>, vector<8x32xf32>
    %c56_177 = arith.constant 56 : index
    %c0_178 = arith.constant 0 : index
    %142 = vector.load %arg18[%c56_177, %c0_178] : memref<64x32xf32, #tpu.memory_space<vmem>>, vector<8x32xf32>
    tpu.vector_store %arg18[%c56_177, %c0_178], %141 {strides = array<i32>} : memref<64x32xf32, #tpu.memory_space<vmem>>, vector<8x32xf32>,
    %c0_179 = arith.constant 0 : index
    %c0_180 = arith.constant 0 : index
    %143 = vector.load %arg18[%c0_179, %c0_180] : memref<64x32xf32, #tpu.memory_space<vmem>>, vector<64x32xf32>
    %144 = arith.truncf %143 : vector<64x32xf32> to vector<64x32xbf16>
    %c5 = arith.constant 5 : index
    %c0_181 = arith.constant 0 : index
    %c0_182 = arith.constant 0 : index
    %145 = vector.load %arg5[%c5, %c0_181, %c0_182] : memref<9x32x32xbf16, #tpu.memory_space<vmem>>, vector<1x32x32xbf16>
    %146 = vector.shape_cast %145 : vector<1x32x32xbf16> to vector<32x32xbf16>
    %cst_183 = arith.constant dense<0.000000e+00> : vector<64x32xf32>
    %147 = tpu.matmul %144, %146, %cst_183 {dimension_numbers = #tpu.dot_dimension_numbers<[1], [0], [0], [1], [0, 0, 1, 1], [], []>} : vector<64x32xbf16>, vector<32x32xbf16>, vector<64x32xf32> -> vector<64x32xf32>
    %148 = arith.addf %126, %147 : vector<64x32xf32>
    %c9_184 = arith.constant 9 : index
    %c0_185 = arith.constant 0 : index
    %149 = vector.load %arg17[%c9_184, %c0_185] : memref<324x32xf32, #tpu.memory_space<vmem>>, vector<8x32xf32>
    %c0_186 = arith.constant 0 : index
    %c0_187 = arith.constant 0 : index
    %150 = vector.load %arg18[%c0_186, %c0_187] : memref<64x32xf32, #tpu.memory_space<vmem>>, vector<8x32xf32>
    tpu.vector_store %arg18[%c0_186, %c0_187], %149 {strides = array<i32>} : memref<64x32xf32, #tpu.memory_space<vmem>>, vector<8x32xf32>,
    %c18_188 = arith.constant 18 : index
    %c0_189 = arith.constant 0 : index
    %151 = vector.load %arg17[%c18_188, %c0_189] : memref<324x32xf32, #tpu.memory_space<vmem>>, vector<8x32xf32>
    %c8_190 = arith.constant 8 : index
    %c0_191 = arith.constant 0 : index
    %152 = vector.load %arg18[%c8_190, %c0_191] : memref<64x32xf32, #tpu.memory_space<vmem>>, vector<8x32xf32>
    tpu.vector_store %arg18[%c8_190, %c0_191], %151 {strides = array<i32>} : memref<64x32xf32, #tpu.memory_space<vmem>>, vector<8x32xf32>,
    %c27_192 = arith.constant 27 : index
    %c0_193 = arith.constant 0 : index
    %153 = vector.load %arg17[%c27_192, %c0_193] : memref<324x32xf32, #tpu.memory_space<vmem>>, vector<8x32xf32>
    %c16_194 = arith.constant 16 : index
    %c0_195 = arith.constant 0 : index
    %154 = vector.load %arg18[%c16_194, %c0_195] : memref<64x32xf32, #tpu.memory_space<vmem>>, vector<8x32xf32>
    tpu.vector_store %arg18[%c16_194, %c0_195], %153 {strides = array<i32>} : memref<64x32xf32, #tpu.memory_space<vmem>>, vector<8x32xf32>,
    %c36_196 = arith.constant 36 : index
    %c0_197 = arith.constant 0 : index
    %155 = vector.load %arg17[%c36_196, %c0_197] : memref<324x32xf32, #tpu.memory_space<vmem>>, vector<8x32xf32>
    %c24_198 = arith.constant 24 : index
    %c0_199 = arith.constant 0 : index
    %156 = vector.load %arg18[%c24_198, %c0_199] : memref<64x32xf32, #tpu.memory_space<vmem>>, vector<8x32xf32>
    tpu.vector_store %arg18[%c24_198, %c0_199], %155 {strides = array<i32>} : memref<64x32xf32, #tpu.memory_space<vmem>>, vector<8x32xf32>,
    %c45_200 = arith.constant 45 : index
    %c0_201 = arith.constant 0 : index
    %157 = vector.load %arg17[%c45_200, %c0_201] : memref<324x32xf32, #tpu.memory_space<vmem>>, vector<8x32xf32>
    %c32_202 = arith.constant 32 : index
    %c0_203 = arith.constant 0 : index
    %158 = vector.load %arg18[%c32_202, %c0_203] : memref<64x32xf32, #tpu.memory_space<vmem>>, vector<8x32xf32>
    tpu.vector_store %arg18[%c32_202, %c0_203], %157 {strides = array<i32>} : memref<64x32xf32, #tpu.memory_space<vmem>>, vector<8x32xf32>,
    %c54_204 = arith.constant 54 : index
    %c0_205 = arith.constant 0 : index
    %159 = vector.load %arg17[%c54_204, %c0_205] : memref<324x32xf32, #tpu.memory_space<vmem>>, vector<8x32xf32>
    %c40_206 = arith.constant 40 : index
    %c0_207 = arith.constant 0 : index
    %160 = vector.load %arg18[%c40_206, %c0_207] : memref<64x32xf32, #tpu.memory_space<vmem>>, vector<8x32xf32>
    tpu.vector_store %arg18[%c40_206, %c0_207], %159 {strides = array<i32>} : memref<64x32xf32, #tpu.memory_space<vmem>>, vector<8x32xf32>,
    %c63_208 = arith.constant 63 : index
    %c0_209 = arith.constant 0 : index
    %161 = vector.load %arg17[%c63_208, %c0_209] : memref<324x32xf32, #tpu.memory_space<vmem>>, vector<8x32xf32>
    %c48_210 = arith.constant 48 : index
    %c0_211 = arith.constant 0 : index
    %162 = vector.load %arg18[%c48_210, %c0_211] : memref<64x32xf32, #tpu.memory_space<vmem>>, vector<8x32xf32>
    tpu.vector_store %arg18[%c48_210, %c0_211], %161 {strides = array<i32>} : memref<64x32xf32, #tpu.memory_space<vmem>>, vector<8x32xf32>,
    %c72 = arith.constant 72 : index
    %c0_212 = arith.constant 0 : index
    %163 = vector.load %arg17[%c72, %c0_212] : memref<324x32xf32, #tpu.memory_space<vmem>>, vector<8x32xf32>
    %c56_213 = arith.constant 56 : index
    %c0_214 = arith.constant 0 : index
    %164 = vector.load %arg18[%c56_213, %c0_214] : memref<64x32xf32, #tpu.memory_space<vmem>>, vector<8x32xf32>
    tpu.vector_store %arg18[%c56_213, %c0_214], %163 {strides = array<i32>} : memref<64x32xf32, #tpu.memory_space<vmem>>, vector<8x32xf32>,
    %c0_215 = arith.constant 0 : index
    %c0_216 = arith.constant 0 : index
    %165 = vector.load %arg18[%c0_215, %c0_216] : memref<64x32xf32, #tpu.memory_space<vmem>>, vector<64x32xf32>
    %166 = arith.truncf %165 : vector<64x32xf32> to vector<64x32xbf16>
    %c6 = arith.constant 6 : index
    %c0_217 = arith.constant 0 : index
    %c0_218 = arith.constant 0 : index
    %167 = vector.load %arg5[%c6, %c0_217, %c0_218] : memref<9x32x32xbf16, #tpu.memory_space<vmem>>, vector<1x32x32xbf16>
    %168 = vector.shape_cast %167 : vector<1x32x32xbf16> to vector<32x32xbf16>
    %cst_219 = arith.constant dense<0.000000e+00> : vector<64x32xf32>
    %169 = tpu.matmul %166, %168, %cst_219 {dimension_numbers = #tpu.dot_dimension_numbers<[1], [0], [0], [1], [0, 0, 1, 1], [], []>} : vector<64x32xbf16>, vector<32x32xbf16>, vector<64x32xf32> -> vector<64x32xf32>
    %170 = arith.addf %148, %169 : vector<64x32xf32>
    %c90_220 = arith.constant 90 : index
    %c0_221 = arith.constant 0 : index
    %171 = vector.load %arg17[%c90_220, %c0_221] : memref<324x32xf32, #tpu.memory_space<vmem>>, vector<8x32xf32>
    %c0_222 = arith.constant 0 : index
    %c0_223 = arith.constant 0 : index
    %172 = vector.load %arg18[%c0_222, %c0_223] : memref<64x32xf32, #tpu.memory_space<vmem>>, vector<8x32xf32>
    tpu.vector_store %arg18[%c0_222, %c0_223], %171 {strides = array<i32>} : memref<64x32xf32, #tpu.memory_space<vmem>>, vector<8x32xf32>,
    %c99_224 = arith.constant 99 : index
    %c0_225 = arith.constant 0 : index
    %173 = vector.load %arg17[%c99_224, %c0_225] : memref<324x32xf32, #tpu.memory_space<vmem>>, vector<8x32xf32>
    %c8_226 = arith.constant 8 : index
    %c0_227 = arith.constant 0 : index
    %174 = vector.load %arg18[%c8_226, %c0_227] : memref<64x32xf32, #tpu.memory_space<vmem>>, vector<8x32xf32>
    tpu.vector_store %arg18[%c8_226, %c0_227], %173 {strides = array<i32>} : memref<64x32xf32, #tpu.memory_space<vmem>>, vector<8x32xf32>,
    %c108_228 = arith.constant 108 : index
    %c0_229 = arith.constant 0 : index
    %175 = vector.load %arg17[%c108_228, %c0_229] : memref<324x32xf32, #tpu.memory_space<vmem>>, vector<8x32xf32>
    %c16_230 = arith.constant 16 : index
    %c0_231 = arith.constant 0 : index
    %176 = vector.load %arg18[%c16_230, %c0_231] : memref<64x32xf32, #tpu.memory_space<vmem>>, vector<8x32xf32>
    tpu.vector_store %arg18[%c16_230, %c0_231], %175 {strides = array<i32>} : memref<64x32xf32, #tpu.memory_space<vmem>>, vector<8x32xf32>,
    %c117_232 = arith.constant 117 : index
    %c0_233 = arith.constant 0 : index
    %177 = vector.load %arg17[%c117_232, %c0_233] : memref<324x32xf32, #tpu.memory_space<vmem>>, vector<8x32xf32>
    %c24_234 = arith.constant 24 : index
    %c0_235 = arith.constant 0 : index
    %178 = vector.load %arg18[%c24_234, %c0_235] : memref<64x32xf32, #tpu.memory_space<vmem>>, vector<8x32xf32>
    tpu.vector_store %arg18[%c24_234, %c0_235], %177 {strides = array<i32>} : memref<64x32xf32, #tpu.memory_space<vmem>>, vector<8x32xf32>,
    %c126_236 = arith.constant 126 : index
    %c0_237 = arith.constant 0 : index
    %179 = vector.load %arg17[%c126_236, %c0_237] : memref<324x32xf32, #tpu.memory_space<vmem>>, vector<8x32xf32>
    %c32_238 = arith.constant 32 : index
    %c0_239 = arith.constant 0 : index
    %180 = vector.load %arg18[%c32_238, %c0_239] : memref<64x32xf32, #tpu.memory_space<vmem>>, vector<8x32xf32>
    tpu.vector_store %arg18[%c32_238, %c0_239], %179 {strides = array<i32>} : memref<64x32xf32, #tpu.memory_space<vmem>>, vector<8x32xf32>,
    %c135_240 = arith.constant 135 : index
    %c0_241 = arith.constant 0 : index
    %181 = vector.load %arg17[%c135_240, %c0_241] : memref<324x32xf32, #tpu.memory_space<vmem>>, vector<8x32xf32>
    %c40_242 = arith.constant 40 : index
    %c0_243 = arith.constant 0 : index
    %182 = vector.load %arg18[%c40_242, %c0_243] : memref<64x32xf32, #tpu.memory_space<vmem>>, vector<8x32xf32>
    tpu.vector_store %arg18[%c40_242, %c0_243], %181 {strides = array<i32>} : memref<64x32xf32, #tpu.memory_space<vmem>>, vector<8x32xf32>,
    %c144_244 = arith.constant 144 : index
    %c0_245 = arith.constant 0 : index
    %183 = vector.load %arg17[%c144_244, %c0_245] : memref<324x32xf32, #tpu.memory_space<vmem>>, vector<8x32xf32>
    %c48_246 = arith.constant 48 : index
    %c0_247 = arith.constant 0 : index
    %184 = vector.load %arg18[%c48_246, %c0_247] : memref<64x32xf32, #tpu.memory_space<vmem>>, vector<8x32xf32>
    tpu.vector_store %arg18[%c48_246, %c0_247], %183 {strides = array<i32>} : memref<64x32xf32, #tpu.memory_space<vmem>>, vector<8x32xf32>,
    %c153 = arith.constant 153 : index
    %c0_248 = arith.constant 0 : index
    %185 = vector.load %arg17[%c153, %c0_248] : memref<324x32xf32, #tpu.memory_space<vmem>>, vector<8x32xf32>
    %c56_249 = arith.constant 56 : index
    %c0_250 = arith.constant 0 : index
    %186 = vector.load %arg18[%c56_249, %c0_250] : memref<64x32xf32, #tpu.memory_space<vmem>>, vector<8x32xf32>
    tpu.vector_store %arg18[%c56_249, %c0_250], %185 {strides = array<i32>} : memref<64x32xf32, #tpu.memory_space<vmem>>, vector<8x32xf32>,
    %c0_251 = arith.constant 0 : index
    %c0_252 = arith.constant 0 : index
    %187 = vector.load %arg18[%c0_251, %c0_252] : memref<64x32xf32, #tpu.memory_space<vmem>>, vector<64x32xf32>
    %188 = arith.truncf %187 : vector<64x32xf32> to vector<64x32xbf16>
    %c7 = arith.constant 7 : index
    %c0_253 = arith.constant 0 : index
    %c0_254 = arith.constant 0 : index
    %189 = vector.load %arg5[%c7, %c0_253, %c0_254] : memref<9x32x32xbf16, #tpu.memory_space<vmem>>, vector<1x32x32xbf16>
    %190 = vector.shape_cast %189 : vector<1x32x32xbf16> to vector<32x32xbf16>
    %cst_255 = arith.constant dense<0.000000e+00> : vector<64x32xf32>
    %191 = tpu.matmul %188, %190, %cst_255 {dimension_numbers = #tpu.dot_dimension_numbers<[1], [0], [0], [1], [0, 0, 1, 1], [], []>} : vector<64x32xbf16>, vector<32x32xbf16>, vector<64x32xf32> -> vector<64x32xf32>
    %192 = arith.addf %170, %191 : vector<64x32xf32>
    %c10_256 = arith.constant 10 : index
    %c0_257 = arith.constant 0 : index
    %193 = vector.load %arg17[%c10_256, %c0_257] : memref<324x32xf32, #tpu.memory_space<vmem>>, vector<8x32xf32>
    %c0_258 = arith.constant 0 : index
    %c0_259 = arith.constant 0 : index
    %194 = vector.load %arg18[%c0_258, %c0_259] : memref<64x32xf32, #tpu.memory_space<vmem>>, vector<8x32xf32>
    tpu.vector_store %arg18[%c0_258, %c0_259], %193 {strides = array<i32>} : memref<64x32xf32, #tpu.memory_space<vmem>>, vector<8x32xf32>,
    %c19_260 = arith.constant 19 : index
    %c0_261 = arith.constant 0 : index
    %195 = vector.load %arg17[%c19_260, %c0_261] : memref<324x32xf32, #tpu.memory_space<vmem>>, vector<8x32xf32>
    %c8_262 = arith.constant 8 : index
    %c0_263 = arith.constant 0 : index
    %196 = vector.load %arg18[%c8_262, %c0_263] : memref<64x32xf32, #tpu.memory_space<vmem>>, vector<8x32xf32>
    tpu.vector_store %arg18[%c8_262, %c0_263], %195 {strides = array<i32>} : memref<64x32xf32, #tpu.memory_space<vmem>>, vector<8x32xf32>,
    %c28_264 = arith.constant 28 : index
    %c0_265 = arith.constant 0 : index
    %197 = vector.load %arg17[%c28_264, %c0_265] : memref<324x32xf32, #tpu.memory_space<vmem>>, vector<8x32xf32>
    %c16_266 = arith.constant 16 : index
    %c0_267 = arith.constant 0 : index
    %198 = vector.load %arg18[%c16_266, %c0_267] : memref<64x32xf32, #tpu.memory_space<vmem>>, vector<8x32xf32>
    tpu.vector_store %arg18[%c16_266, %c0_267], %197 {strides = array<i32>} : memref<64x32xf32, #tpu.memory_space<vmem>>, vector<8x32xf32>,
    %c37_268 = arith.constant 37 : index
    %c0_269 = arith.constant 0 : index
    %199 = vector.load %arg17[%c37_268, %c0_269] : memref<324x32xf32, #tpu.memory_space<vmem>>, vector<8x32xf32>
    %c24_270 = arith.constant 24 : index
    %c0_271 = arith.constant 0 : index
    %200 = vector.load %arg18[%c24_270, %c0_271] : memref<64x32xf32, #tpu.memory_space<vmem>>, vector<8x32xf32>
    tpu.vector_store %arg18[%c24_270, %c0_271], %199 {strides = array<i32>} : memref<64x32xf32, #tpu.memory_space<vmem>>, vector<8x32xf32>,
    %c46_272 = arith.constant 46 : index
    %c0_273 = arith.constant 0 : index
    %201 = vector.load %arg17[%c46_272, %c0_273] : memref<324x32xf32, #tpu.memory_space<vmem>>, vector<8x32xf32>
    %c32_274 = arith.constant 32 : index
    %c0_275 = arith.constant 0 : index
    %202 = vector.load %arg18[%c32_274, %c0_275] : memref<64x32xf32, #tpu.memory_space<vmem>>, vector<8x32xf32>
    tpu.vector_store %arg18[%c32_274, %c0_275], %201 {strides = array<i32>} : memref<64x32xf32, #tpu.memory_space<vmem>>, vector<8x32xf32>,
    %c55_276 = arith.constant 55 : index
    %c0_277 = arith.constant 0 : index
    %203 = vector.load %arg17[%c55_276, %c0_277] : memref<324x32xf32, #tpu.memory_space<vmem>>, vector<8x32xf32>
    %c40_278 = arith.constant 40 : index
    %c0_279 = arith.constant 0 : index
    %204 = vector.load %arg18[%c40_278, %c0_279] : memref<64x32xf32, #tpu.memory_space<vmem>>, vector<8x32xf32>
    tpu.vector_store %arg18[%c40_278, %c0_279], %203 {strides = array<i32>} : memref<64x32xf32, #tpu.memory_space<vmem>>, vector<8x32xf32>,
    %c64_280 = arith.constant 64 : index
    %c0_281 = arith.constant 0 : index
    %205 = vector.load %arg17[%c64_280, %c0_281] : memref<324x32xf32, #tpu.memory_space<vmem>>, vector<8x32xf32>
    %c48_282 = arith.constant 48 : index
    %c0_283 = arith.constant 0 : index
    %206 = vector.load %arg18[%c48_282, %c0_283] : memref<64x32xf32, #tpu.memory_space<vmem>>, vector<8x32xf32>
    tpu.vector_store %arg18[%c48_282, %c0_283], %205 {strides = array<i32>} : memref<64x32xf32, #tpu.memory_space<vmem>>, vector<8x32xf32>,
    %c73 = arith.constant 73 : index
    %c0_284 = arith.constant 0 : index
    %207 = vector.load %arg17[%c73, %c0_284] : memref<324x32xf32, #tpu.memory_space<vmem>>, vector<8x32xf32>
    %c56_285 = arith.constant 56 : index
    %c0_286 = arith.constant 0 : index
    %208 = vector.load %arg18[%c56_285, %c0_286] : memref<64x32xf32, #tpu.memory_space<vmem>>, vector<8x32xf32>
    tpu.vector_store %arg18[%c56_285, %c0_286], %207 {strides = array<i32>} : memref<64x32xf32, #tpu.memory_space<vmem>>, vector<8x32xf32>,
    %c0_287 = arith.constant 0 : index
    %c0_288 = arith.constant 0 : index
    %209 = vector.load %arg18[%c0_287, %c0_288] : memref<64x32xf32, #tpu.memory_space<vmem>>, vector<64x32xf32>
    %210 = arith.truncf %209 : vector<64x32xf32> to vector<64x32xbf16>
    %c8_289 = arith.constant 8 : index
    %c0_290 = arith.constant 0 : index
    %c0_291 = arith.constant 0 : index
    %211 = vector.load %arg5[%c8_289, %c0_290, %c0_291] : memref<9x32x32xbf16, #tpu.memory_space<vmem>>, vector<1x32x32xbf16>
    %212 = vector.shape_cast %211 : vector<1x32x32xbf16> to vector<32x32xbf16>
    %cst_292 = arith.constant dense<0.000000e+00> : vector<64x32xf32>
    %213 = tpu.matmul %210, %212, %cst_292 {dimension_numbers = #tpu.dot_dimension_numbers<[1], [0], [0], [1], [0, 0, 1, 1], [], []>} : vector<64x32xbf16>, vector<32x32xbf16>, vector<64x32xf32> -> vector<64x32xf32>
    %214 = arith.addf %192, %213 : vector<64x32xf32>
    %c0_293 = arith.constant 0 : index
    %c0_294 = arith.constant 0 : index
    %215 = vector.load %arg9[%c0_293, %c0_294] : memref<1x32xf32, #tpu.memory_space<vmem>>, vector<1x32xf32>
    %216 = vector.broadcast %215 : vector<1x32xf32> to vector<64x32xf32>
    %217 = arith.mulf %214, %216 : vector<64x32xf32>
    %c0_295 = arith.constant 0 : index
    %c0_296 = arith.constant 0 : index
    %218 = vector.load %arg10[%c0_295, %c0_296] : memref<1x32xf32, #tpu.memory_space<vmem>>, vector<1x32xf32>
    %219 = vector.broadcast %218 : vector<1x32xf32> to vector<64x32xf32>
    %220 = arith.addf %217, %219 : vector<64x32xf32>
    %cst_297 = arith.constant 0.000000e+00 : f32
    %221 = vector.broadcast %cst_297 : f32 to vector<64x32xf32>
    %222 = arith.maximumf %220, %221 : vector<64x32xf32>
    %223 = arith.truncf %222 : vector<64x32xf32> to vector<64x32xbf16>
    %c0_298 = arith.constant 0 : index
    %c0_299 = arith.constant 0 : index
    %224 = vector.load %arg6[%c0_298, %c0_299] : memref<32x128xbf16, #tpu.memory_space<vmem>>, vector<32x128xbf16>
    %cst_300 = arith.constant dense<0.000000e+00> : vector<64x128xf32>
    %225 = tpu.matmul %223, %224, %cst_300 {dimension_numbers = #tpu.dot_dimension_numbers<[1], [0], [0], [1], [0, 0, 1, 1], [], []>} : vector<64x32xbf16>, vector<32x128xbf16>, vector<64x128xf32> -> vector<64x128xf32>
    %c0_301 = arith.constant 0 : index
    %c0_302 = arith.constant 0 : index
    %226 = vector.load %arg11[%c0_301, %c0_302] : memref<1x128xf32, #tpu.memory_space<vmem>>, vector<1x128xf32>
    %227 = vector.broadcast %226 : vector<1x128xf32> to vector<64x128xf32>
    %228 = arith.mulf %225, %227 : vector<64x128xf32>
    %c0_303 = arith.constant 0 : index
    %c0_304 = arith.constant 0 : index
    %229 = vector.load %arg12[%c0_303, %c0_304] : memref<1x128xf32, #tpu.memory_space<vmem>>, vector<1x128xf32>
    %230 = vector.broadcast %229 : vector<1x128xf32> to vector<64x128xf32>
    %231 = arith.addf %228, %230 : vector<64x128xf32>
    %c0_305 = arith.constant 0 : index
    %c0_306 = arith.constant 0 : index
    %c0_307 = arith.constant 0 : index
    %232 = vector.load %arg2[%c0_305, %c0_306, %c0_307] : memref<1x64x64xbf16, #tpu.memory_space<vmem>>, vector<1x64x64xbf16>
    %233 = vector.shape_cast %232 : vector<1x64x64xbf16> to vector<64x64xbf16>
    %c0_308 = arith.constant 0 : index
    %c0_309 = arith.constant 0 : index
    %234 = vector.load %arg13[%c0_308, %c0_309] : memref<64x128xbf16, #tpu.memory_space<vmem>>, vector<64x128xbf16>
    %cst_310 = arith.constant dense<0.000000e+00> : vector<64x128xf32>
    %235 = tpu.matmul %233, %234, %cst_310 {dimension_numbers = #tpu.dot_dimension_numbers<[1], [0], [0], [1], [0, 0, 1, 1], [], []>} : vector<64x64xbf16>, vector<64x128xbf16>, vector<64x128xf32> -> vector<64x128xf32>
    %c0_311 = arith.constant 0 : index
    %c0_312 = arith.constant 0 : index
    %236 = vector.load %arg14[%c0_311, %c0_312] : memref<1x128xf32, #tpu.memory_space<vmem>>, vector<1x128xf32>
    %237 = vector.broadcast %236 : vector<1x128xf32> to vector<64x128xf32>
    %238 = arith.mulf %235, %237 : vector<64x128xf32>
    %c0_313 = arith.constant 0 : index
    %c0_314 = arith.constant 0 : index
    %239 = vector.load %arg15[%c0_313, %c0_314] : memref<1x128xf32, #tpu.memory_space<vmem>>, vector<1x128xf32>
    %240 = vector.broadcast %239 : vector<1x128xf32> to vector<64x128xf32>
    %241 = arith.addf %238, %240 : vector<64x128xf32>
    %242 = arith.addf %231, %241 : vector<64x128xf32>
    %cst_315 = arith.constant 0.000000e+00 : f32
    %243 = vector.broadcast %cst_315 : f32 to vector<64x128xf32>
    %244 = arith.maximumf %242, %243 : vector<64x128xf32>
    %c0_316 = arith.constant 0 : index
    %c0_317 = arith.constant 0 : index
    %c0_318 = arith.constant 0 : index
    %245 = vector.load %arg16[%c0_316, %c0_317, %c0_318] : memref<1x64x128xf32, #tpu.memory_space<vmem>>, vector<1x64x128xf32>
    %246 = vector.shape_cast %245 : vector<1x64x128xf32> to vector<64x128xf32>
    %247 = vector.shape_cast %244 : vector<64x128xf32> to vector<1x64x128xf32>
    tpu.vector_store %arg16[%c0_316, %c0_317, %c0_318], %247 {strides = array<i32>} : memref<1x64x128xf32, #tpu.memory_space<vmem>>, vector<1x64x128xf32>,
    return
  }
  func.func @transform_0(%arg0: i32) -> (i32, i32, i32) {
    %c0_i32 = arith.constant 0 : i32
    %c0_i32_0 = arith.constant 0 : i32
    %c0_i32_1 = arith.constant 0 : i32
    return %arg0, %c0_i32, %c0_i32_0 : i32, i32, i32
  }
  func.func @transform_1(%arg0: i32) -> (i32, i32, i32) {
    %c0_i32 = arith.constant 0 : i32
    %c0_i32_0 = arith.constant 0 : i32
    %c0_i32_1 = arith.constant 0 : i32
    return %arg0, %c0_i32, %c0_i32_0 : i32, i32, i32
  }
  func.func @transform_2(%arg0: i32) -> (i32, i32) {
    %c0_i32 = arith.constant 0 : i32
    %c0_i32_0 = arith.constant 0 : i32
    %c0_i32_1 = arith.constant 0 : i32
    return %c0_i32, %c0_i32_0 : i32, i32
  }
  func.func @transform_3(%arg0: i32) -> (i32, i32) {
    %c0_i32 = arith.constant 0 : i32
    %c0_i32_0 = arith.constant 0 : i32
    %c0_i32_1 = arith.constant 0 : i32
    return %c0_i32, %c0_i32_0 : i32, i32
  }
  func.func @transform_4(%arg0: i32) -> (i32, i32, i32) {
    %c0_i32 = arith.constant 0 : i32
    %c0_i32_0 = arith.constant 0 : i32
    %c0_i32_1 = arith.constant 0 : i32
    %c0_i32_2 = arith.constant 0 : i32
    return %c0_i32, %c0_i32_0, %c0_i32_1 : i32, i32, i32
  }
  func.func @transform_5(%arg0: i32) -> (i32, i32) {
    %c0_i32 = arith.constant 0 : i32
    %c0_i32_0 = arith.constant 0 : i32
    %c0_i32_1 = arith.constant 0 : i32
    return %c0_i32, %c0_i32_0 : i32, i32
  }
  func.func @transform_6(%arg0: i32) -> (i32, i32) {
    %c0_i32 = arith.constant 0 : i32
    %c0_i32_0 = arith.constant 0 : i32
    %c0_i32_1 = arith.constant 0 : i32
    return %c0_i32, %c0_i32_0 : i32, i32
  }
  func.func @transform_7(%arg0: i32) -> (i32, i32) {
    %c0_i32 = arith.constant 0 : i32
    %c0_i32_0 = arith.constant 0 : i32
    %c0_i32_1 = arith.constant 0 : i32
    return %c0_i32, %c0_i32_0 : i32, i32
  }
  func.func @transform_8(%arg0: i32) -> (i32, i32) {
    %c0_i32 = arith.constant 0 : i32
    %c0_i32_0 = arith.constant 0 : i32
    %c0_i32_1 = arith.constant 0 : i32
    return %c0_i32, %c0_i32_0 : i32, i32
  }
  func.func @transform_9(%arg0: i32) -> (i32, i32) {
    %c0_i32 = arith.constant 0 : i32
    %c0_i32_0 = arith.constant 0 : i32
    %c0_i32_1 = arith.constant 0 : i32
    return %c0_i32, %c0_i32_0 : i32, i32
  }
  func.func @transform_10(%arg0: i32) -> (i32, i32) {
    %c0_i32 = arith.constant 0 : i32
    %c0_i32_0 = arith.constant 0 : i32
    %c0_i32_1 = arith.constant 0 : i32
    return %c0_i32, %c0_i32_0 : i32, i32
  }
  func.func @transform_11(%arg0: i32) -> (i32, i32) {
    %c0_i32 = arith.constant 0 : i32
    %c0_i32_0 = arith.constant 0 : i32
    %c0_i32_1 = arith.constant 0 : i32
    return %c0_i32, %c0_i32_0 : i32, i32
  }
  func.func @transform_12(%arg0: i32) -> (i32, i32) {
    %c0_i32 = arith.constant 0 : i32
    %c0_i32_0 = arith.constant 0 : i32
    %c0_i32_1 = arith.constant 0 : i32
    return %c0_i32, %c0_i32_0 : i32, i32
  }
  func.func @transform_13(%arg0: i32) -> (i32, i32) {
    %c0_i32 = arith.constant 0 : i32
    %c0_i32_0 = arith.constant 0 : i32
    %c0_i32_1 = arith.constant 0 : i32
    return %c0_i32, %c0_i32_0 : i32, i32
  }
  func.func @transform_14(%arg0: i32) -> (i32, i32) {
    %c0_i32 = arith.constant 0 : i32
    %c0_i32_0 = arith.constant 0 : i32
    %c0_i32_1 = arith.constant 0 : i32
    return %c0_i32, %c0_i32_0 : i32, i32
  }
  func.func @transform_15(%arg0: i32) -> (i32, i32, i32) {
    %c0_i32 = arith.constant 0 : i32
    %c0_i32_0 = arith.constant 0 : i32
    %c0_i32_1 = arith.constant 0 : i32
    return %arg0, %c0_i32, %c0_i32_0 : i32, i32, i32
  }
}

</mosaic_0001>

<bundles_post_ra>
// kernel: bottleneck_forward.1
= control target key start
LH: loop header
LB: loop body
LE: loop exit
PB: predicated region body
PF: predicated region fallthrough
CT: control target
= control target key end

     0   :  { %20 = vsyncpa [#allocation5], 0  ;;  %s4770_s0 = inlined_call_operand.vmem [shape: bf16[2,324,64], index: 0, kind: input, shape index: {}]   ;;  %s4771_s1 = inlined_call_operand.vmem [shape: bf16[2,64,64], index: 1, kind: input, shape index: {}]   ;;  %s4772_s2 = inlined_call_operand.vmem [shape: f32[324,1], index: 2, kind: input, shape index: {}]   ;;  %s4773_s3 = inlined_call_operand.vmem [shape: bf16[64,32], index: 3, kind: input, shape index: {}]   ;;  %s4774_s4 = inlined_call_operand.vmem [shape: bf16[9,32,32], index: 4, kind: input, shape index: {}]   ;;  %s4775_s5 = inlined_call_operand.vmem [shape: bf16[32,128], index: 5, kind: input, shape index: {}]   ;;  %s4776_s6 = inlined_call_operand.vmem [shape: f32[1,32], index: 6, kind: input, shape index: {}]   ;;  %s4777_s7 = inlined_call_operand.vmem [shape: f32[1,32], index: 7, kind: input, shape index: {}]   ;;  %s4778_s8 = inlined_call_operand.vmem [shape: f32[1,32], index: 8, kind: input, shape index: {}]   ;;  %s4779_s9 = inlined_call_operand.vmem [shape: f32[1,32], index: 9, kind: input, shape index: {}]   ;;  %s4780_s10 = inlined_call_operand.vmem [shape: f32[1,128], index: 10, kind: input, shape index: {}]   ;;  %s4781_s11 = inlined_call_operand.vmem [shape: f32[1,128], index: 11, kind: input, shape index: {}]   ;;  %s4782_s12 = inlined_call_operand.vmem [shape: bf16[64,128], index: 12, kind: input, shape index: {}]   ;;  %s4783_s13 = inlined_call_operand.vmem [shape: f32[1,128], index: 13, kind: input, shape index: {}]   ;;  %s4784_s14 = inlined_call_operand.vmem [shape: f32[1,128], index: 14, kind: input, shape index: {}]   ;;  %s4785_s15 = inlined_call_operand.hbm [shape: f32[2,64,128], index: 15, kind: output, shape index: {}]  }
   0x1   :  { %22 = vsyncpa [#allocation5 + $0x1], 0  ;;  %s3826_s18 = smov 0   ;;  %s3828_s19 = smov 0  }
   0x2   :  { %s3830_s20 = smov 0   ;;  %s3832_s21 = smov 0  }
   0x3 LB: > { %4791 = sst [smem:[#allocation7_spill]] %s3726_s18  ;;  %s3847_s22 = sadd.s32 4294967295, %s3738_s21   ;;  %s3738_s21 = sphi %s3832_s21, %s4800_s21   ;;  %s3734_s20 = sphi %s3830_s20, %s4802_s20   ;;  %s3730_s19 = sphi %s3828_s19, %s4804_s19   ;;  %s3726_s18 = sphi %s3826_s18, %s4803_s18  }
   0x4   : > { %4792 = sst [smem:[#allocation8_spill]] %s3734_s20  ;;  %s3018_s23 = sadd.s32 4294967294, %s3738_s21  }
   0x5   : > { %s3851_s24 = sadd.s32 1, %s3738_s21   ;;  %s360_s25 = sadd.s32 1, %s3734_s20 }
   0x6   : > { %4793 = sst [smem:[#allocation9_spill]] %s3851_s24  ;;  %s357_s26 = ssub.s32 %s3738_s21, %s3851_s24 }
   0x7   : > { %p370_p0 = scmp.ne.s32.totalorder %s3734_s20, %s3730_s19  ;;  %p358_p1 = scmp.eq.s32.totalorder %s357_s26, 0 }
   0x8   : > { %p371_p2 = scmp.eq.s32.totalorder %s3847_s22, 1  ;;  %p376_p3 = scmp.ne.s32.totalorder %s3730_s19, %s3726_s18 }
   0x9   : > { %p377_p4 = scmp.eq.s32.totalorder %s3018_s23, 1  ;;  %p3021_p7 = scmp.ge.s32.totalorder %s3738_s21, 1 }
   0xa   : > { %s3862_s27 = scalar_select %p358_p1, %s3734_s20, %s360_s25  }
   0xb   : > { %p3864_p5 = por %p371_p2, %p370_p0  ;;  %p3868_p6 = por %p377_p4, %p376_p3 }
   0xc   : > { %4794 = sst [smem:[#allocation10_spill]] %s3862_s27  ;;  %p450_p8 = scmp.lt.s32.totalorder %s3738_s21, 3 }
   0xd   : > { %s4796_s29 = scalar_select %p3868_p6, 1, 0 }
   0xe   : > { %p451_p9 = pnand %p3021_p7, %p450_p8 }
   0xf   : > { %4797 = sst [smem:[#allocation11_spill]] %s4796_s29  ;;  %v3623_v0 = vld [vmem:[%s4773_s3] sm:$0xff] (!%p451_p9)   ;;  %v3740_v1 = vmov (!%p451_p9), 0.0   ;;  %v3624_v2 = vld [vmem:[%s4773_s3 + $0x8] sm:$0xff] (!%p451_p9)   ;;  %vm3741_vm0 = vmmov (!%p451_p9), 0   ;;  %p503_p10 = scmp.lt.s32.totalorder (!%p451_p9), %s3847_s22, 1 }
  0x10   : > { %454 = sbr.rel (%p451_p9) target bundleno = 967 (0x3c7), region = 80  ;;  %3284 = vmatprep.subr.bf16.mxu0 (!%p451_p9), %v3740_v1  ;;  %3292 = vmatprep.mubr.msk.bf16.mxu0 (!%p451_p9), %vm3741_vm0, %v3740_v1  ;;  %v1091_v3 = vld [vmem:[%s4772_s2] sm:$0xff] (!%p451_p9)  ;;  %v3742_v4 = vmov (!%p451_p9), 0   ;;  %v3625_v5 = vld [vmem:[%s4773_s3 + $0x10] sm:$0xff] (!%p451_p9)   ;;  %v1092_v7 = vld [vmem:[%s4772_s2 + $0x8] sm:$0xff] (!%p451_p9)  ;;  %vm690_vm1 = vcmask (!%p451_p9), 523264  }
  0x11   : > { %3285 = vmatpush3.bf16.msra.mxu0 (!%p451_p9), %v3623_v0  ;;  %3621 = vset.pattern.permute.xlu0 (!%p451_p9), %v3742_v4  ;;  %v1093_v6 = vld [vmem:[%s4772_s2 + $0x10] sm:$0xff] (!%p451_p9)  ;;  %v1094_v8 = vld [vmem:[%s4772_s2 + $0x18] sm:$0xff] (!%p451_p9)  ;;  %v1095_v10 = vld [vmem:[%s4772_s2 + $0x20] sm:$0xff] (!%p451_p9)  ;;  %vm1378_vm2 = vcmask (!%p451_p9), 261120   ;;  %s3190_s29 = sshll.u32 (!%p451_p9), %s3847_s22, 10  ;;  %s3743_s17 = smov (!%p451_p9), [#allocation4]  }
  0x12   : > { %3286 = vmatprep.subr.bf16.mxu0 (!%p451_p9), %v3740_v1  ;;  %3622 = vset.pattern.permute.xlu1 (!%p451_p9), %v3742_v4  ;;  %v3626_v9 = vld [vmem:[%s4773_s3 + $0x18] sm:$0xff] (!%p451_p9)   ;;  %v1096_v11 = vld [vmem:[%s4772_s2 + $0x28] sm:$0xff] (!%p451_p9)  ;;  %v1097_v13 = vld [vmem:[%s4772_s2 + $0x30] sm:$0xff] (!%p451_p9) }
  0x13   : > { %1134 = vperm.xlu0 (!%p451_p9), %3621, %v1091_v3   ;;  %1144 = vperm.xlu1 (!%p451_p9), %3622, %v1093_v6   ;;  %v1101_v14 = vld [vmem:[%s4772_s2 + $0x50] sm:$0xff] (!%p451_p9)  ;;  %v1102_v15 = vld [vmem:[%s4772_s2 + $0x58] sm:$0xff] (!%p451_p9)  ;;  %v1103_v16 = vld [vmem:[%s4772_s2 + $0x60] sm:$0xff] (!%p451_p9) }
  0x14   : > { %v1098_v18 = vld [vmem:[%s4772_s2 + $0x38] sm:$0xff] (!%p451_p9)  ;;  %v1099_v19 = vld [vmem:[%s4772_s2 + $0x40] sm:$0xff] (!%p451_p9)  ;;  %v1104_v20 = vld [vmem:[%s4772_s2 + $0x68] sm:$0xff] (!%p451_p9) }
  0x15   : > { %3287 = vmatpush3.bf16.msra.mxu0 (!%p451_p9), %v3624_v2  ;;  %v1105_v21 = vld [vmem:[%s4772_s2 + $0x70] sm:$0xff] (!%p451_p9)  ;;  %v1106_v23 = vld [vmem:[%s4772_s2 + $0x78] sm:$0xff] (!%p451_p9)  ;;  %v1107_v24 = vld [vmem:[%s4772_s2 + $0x80] sm:$0xff] (!%p451_p9) }
  0x16   : > { %3288 = vmatprep.subr.bf16.mxu0 (!%p451_p9), %v3740_v1  ;;  %v1108_v25 = vld [vmem:[%s4772_s2 + $0x88] sm:$0xff] (!%p451_p9)  ;;  %v1109_v26 = vld [vmem:[%s4772_s2 + $0x90] sm:$0xff] (!%p451_p9)  ;;  %v1111_v28 = vld [vmem:[%s4772_s2 + $0xa0] sm:$0xff] (!%p451_p9) }
  0x17   : > { %s3886_s25 = scalar_select %p503_p10, %s3847_s22, 1  ;;  %1139 = vperm.xlu0 %3621, %v1092_v7   ;;  %1149 = vperm.xlu1 %3622, %v1094_v8   ;;  %v1112_v29 = vld [vmem:[%s4772_s2 + $0xa8] sm:$0xff]  ;;  %v1113_v30 = vld [vmem:[%s4772_s2 + $0xb0] sm:$0xff]  ;;  %v1114_v31 = vld [vmem:[%s4772_s2 + $0xb8] sm:$0xff] }
  0x18   : > { %v1115_v33 = vld [vmem:[%s4772_s2 + $0xc0] sm:$0xff]  ;;  %v1116_v34 = vld [vmem:[%s4772_s2 + $0xc8] sm:$0xff]  ;;  %v1117_v35 = vld [vmem:[%s4772_s2 + $0xd0] sm:$0xff] }
  0x19   : > { %s3576_s23 = smul.u32 164, %s3886_s25  ;;  %3289 = vmatpush3.bf16.msra.mxu0 %v3625_v5  ;;  %v1118_v36 = vld [vmem:[%s4772_s2 + $0xd8] sm:$0xff]  ;;  %v1119_v38 = vld [vmem:[%s4772_s2 + $0xe0] sm:$0xff]  ;;  %v1120_v39 = vld [vmem:[%s4772_s2 + $0xe8] sm:$0xff]  ;;  %s3189_s20 = sshll.u32 %s3886_s25, 5 }
  0x1a   : > { %3290 = vmatprep.subr.bf16.mxu0 %v3740_v1  ;;  %v1121_v40 = vld [vmem:[%s4772_s2 + $0xf0] sm:$0xff]  ;;  %v1122_v41 = vld [vmem:[%s4772_s2 + $0xf8] sm:$0xff]  ;;  %v1123_v43 = vld [vmem:[%s4772_s2 + $0x100] sm:$0xff]  ;;  %s4664_s26 = scalar_lea.vmem %s4771_s1, %s3189_s20  ;;  %s3680_s20 = sshll.u32 %s3743_s17, 4  ;;  %s3681_s20 = int_to_ptr.vmem [resolvable:$false] %s3680_s20 }
  0x1b   : > { %s3905_s18 = scalar_lea.vmem %s4770_s0, %s3576_s23  ;;  %1154 = vperm.xlu0 %3621, %v1095_v10   ;;  %1159 = vperm.xlu1 %3622, %v1096_v11   ;;  %v1124_v44 = vld [vmem:[%s4772_s2 + $0x108] sm:$0xff]  ;;  %v1125_v45 = vld [vmem:[%s4772_s2 + $0x110] sm:$0xff]  ;;  %v1126_v46 = vld [vmem:[%s4772_s2 + $0x118] sm:$0xff] }
  0x1c   : > { %v3627_v12 = vld [vmem:[%s3905_s18] sm:$0xff]   ;;  %v3628_v17 = vld [vmem:[%s3905_s18 + $0x8] sm:$0xff]   ;;  %v3629_v22 = vld [vmem:[%s3905_s18 + $0x10] sm:$0xff]  }
  0x1d   : > { %3291 = vmatpush3.bf16.msra.mxu0 %v3626_v9  ;;  %v3630_v27 = vld [vmem:[%s3905_s18 + $0x18] sm:$0xff]   ;;  %v3631_v32 = vld [vmem:[%s3905_s18 + $0x20] sm:$0xff]   ;;  %v3632_v37 = vld [vmem:[%s3905_s18 + $0x28] sm:$0xff]  }
  0x1e   : > { %v3633_v42 = vld [vmem:[%s3905_s18 + $0x30] sm:$0xff]   ;;  %v3634_v47 = vld [vmem:[%s3905_s18 + $0x38] sm:$0xff]   ;;  %v1127_v48 = vld [vmem:[%s4772_s2 + $0x120] sm:$0xff] }
  0x1f   : > { %1164 = vperm.xlu0 %3621, %v1097_v13   ;;  %1184 = vperm.xlu1 %3622, %v1101_v14   ;;  %v1128_v49 = vld [vmem:[%s4772_s2 + $0x128] sm:$0xff]  ;;  %v1129_v50 = vld [vmem:[%s4772_s2 + $0x130] sm:$0xff]  ;;  %v1130_v51 = vld [vmem:[%s4772_s2 + $0x138] sm:$0xff] }
  0x20   : > { %3293 = vmatmul.mubr.msk.bf16.vlgmr.msra.gmra.mrb[0].mxu0 %vm690_vm1, %v3627_v12  ;;  %v3635_v52 = vld [vmem:[%s3905_s18 + $0x40] sm:$0xff]   ;;  %v1100_v53 = vld [vmem:[%s4772_s2 + $0x48] sm:$0xff]  ;;  %v1110_v54 = vld [vmem:[%s4772_s2 + $0x98] sm:$0xff] }
  0x21   : > { %3296 = vmatprep.mubr.msk.bf16.mxu0 %vm3741_vm0, %v3740_v1  ;;  %v1131_v55 = vld [vmem:[%s4772_s2 + $0x140] sm:$0xf]  ;;  %v3636_v56 = vld [vmem:[%s3905_s18 + $0x48] sm:$0xff]   ;;  %v3637_v57 = vld [vmem:[%s3905_s18 + $0x50] sm:$0xff]  }
  0x22   : > { %v3638_v58 = vld [vmem:[%s3905_s18 + $0x58] sm:$0xff]   ;;  %v3639_v59 = vld [vmem:[%s3905_s18 + $0x60] sm:$0xff]   ;;  %v3640_v60 = vld [vmem:[%s3905_s18 + $0x68] sm:$0xff]  }
  0x23   : > { %1189 = vperm.xlu0 %3621, %v1102_v15   ;;  %1194 = vperm.xlu1 %3622, %v1103_v16   ;;  %v3641_v61 = vld [vmem:[%s3905_s18 + $0x70] sm:$0xff]   ;;  %v3642_v62 = vld [vmem:[%s3905_s18 + $0x78] sm:$0xff]   ;;  %v3643_v63 = vld [vmem:[%s3905_s18 + $0x80] sm:$0xff]  }
  0x24   : > { %v3644_v0 = vld [vmem:[%s3905_s18 + $0x88] sm:$0xff]   ;;  %v3645_v3 = vld [vmem:[%s3905_s18 + $0x90] sm:$0xff]   ;;  %v3646_v6 = vld [vmem:[%s3905_s18 + $0x98] sm:$0xff]  }
  0x25   : > { %v3647_v8 = vld [vmem:[%s3905_s18 + $0xa0] ss:$0 sps:$4 sm:$0x33]   ;;  %v3648_v9 = vld [vmem:[%s4774_s4 + $0x10] sm:$0xff]   ;;  %v3649_v11 = vld [vmem:[%s4774_s4 + $0x18] sm:$0xff]   ;;  %s500_s18 = sand.u32 1, %s3730_s19  }
  0x26   : > { %3376 = vmatprep.subr.bf16.mxu1 %v3648_v9  ;;  %v4128_v15 = vld [vmem:[%s4774_s4] sm:$0xff]   ;;  %s3022_s27 = sshll.u32 %s500_s18, 6  ;;  %s4729_s22 = scalar_lea.sflag [#allocation5], %s500_s18 }
  0x27   : > { %1169 = vperm.xlu0 %3621, %v1098_v18   ;;  %1174 = vperm.xlu1 %3622, %v1099_v19   ;;  %s4708_s24 = scalar_lea.vmem [#allocation4], %s3022_s27  ;;  %s3682_s27 = scalar_lea.vmem %s3681_s20, 2048 }
  0x28   : > { %3297 = vmatmul.mubr.msk.bf16.gmra.mrb[4].mxu0 %vm690_vm1, %v3628_v17  ;;  %3377 = vmatpush3.bf16.msra.mxu1 %v3648_v9  ;;  %s2944_s23 = sshll.u32 %s4708_s24, 4  ;;  %s4722_s23 = int_to_ptr.vmem [resolvable:$true] %s2944_s23 }
  0x29   : > { %3300 = vmatprep.mubr.msk.bf16.mxu0 %vm3741_vm0, %v3740_v1  ;;  %3378 = vmatprep.subr.bf16.mxu1 %v3649_v11  ;;  %s3676_s25 = scalar_lea.vmem %s4722_s23, 1024  ;;  %p3683_p0 = scmp.lt.s32.totalorder %s4722_s23, %s3681_s20 }
  0x2a   : > { %p3677_p11 = scmp.ne.s32.totalorder %s4722_s23, %s3676_s25  ;;  %p3684_p1 = scmp.lt.s32.totalorder %s3682_s27, %s3676_s25 }
  0x2b   : > { %1199 = vperm.xlu0 %3621, %v1104_v20   ;;  %1204 = vperm.xlu1 %3622, %v1105_v21  }
  0x2c   : > { %3379 = vmatpush3.bf16.msra.mxu1 %v3649_v11  ;;  %p3678_p12 = pnand %p3677_p11, %p3864_p5  ;;  %p3685_p2 = por %p3684_p1, %p3683_p0 }
  0x2d   : > { %3388 = vmatprep.subr.bf16.mxu1 %v4128_v15 }
  0x2e   : > { %p3679_p13 = pneg %p3678_p12 }
  0x2f   : > { %1209 = vperm.xlu0 %3621, %v1106_v23   ;;  %1214 = vperm.xlu1 %3622, %v1107_v24  }
  0x30   : > { %3301 = vmatmul.mubr.msk.bf16.gmra.mrb[8].mxu0 %vm690_vm1, %v3629_v22  ;;  %p3686_p3 = pnand %p3685_p2, %p3679_p13 }
  0x31   : > { %3304 = vmatprep.mubr.msk.bf16.mxu0 %vm3741_vm0, %v3740_v1 }
  0x33   : > { %1219 = vperm.xlu0 %3621, %v1108_v25   ;;  %1224 = vperm.xlu1 %3622, %v1109_v26   ;;  %v4152_v26 = vld [vmem:[%s4776_s6] ss:$0 sm:$0xff] }
  0x37   : > { %1234 = vperm.xlu0 %3621, %v1111_v28   ;;  %1239 = vperm.xlu1 %3622, %v1112_v29   ;;  %v4157_v28 = vld [vmem:[%s4777_s7] ss:$0 sm:$0xff] }
  0x38   : > { %3305 = vmatmul.mubr.msk.bf16.gmra.mrb[12].mxu0 %vm690_vm1, %v3630_v27 }
  0x39   : > { %3308 = vmatprep.mubr.msk.bf16.mxu0 %vm3741_vm0, %v3740_v1 }
  0x3b   : > { %1244 = vperm.xlu0 %3621, %v1113_v30   ;;  %1249 = vperm.xlu1 %3622, %v1114_v31  }
  0x3f   : > { %1254 = vperm.xlu0 %3621, %v1115_v33   ;;  %1259 = vperm.xlu1 %3622, %v1116_v34  }
  0x40   : > { %3309 = vmatmul.mubr.msk.bf16.gmra.mrb[16].mxu0 %vm690_vm1, %v3631_v32 }
  0x41   : > { %3312 = vmatprep.mubr.msk.bf16.mxu0 %vm3741_vm0, %v3740_v1 }
  0x43   : > { %1264 = vperm.xlu0 %3621, %v1117_v35   ;;  %1269 = vperm.xlu1 %3622, %v1118_v36  }
  0x47   : > { %1274 = vperm.xlu0 %3621, %v1119_v38   ;;  %1279 = vperm.xlu1 %3622, %v1120_v39  }
  0x48   : > { %3313 = vmatmul.mubr.msk.bf16.gmra.mrb[20].mxu0 %vm690_vm1, %v3632_v37 }
  0x49   : > { %3316 = vmatprep.mubr.msk.bf16.mxu0 %vm3741_vm0, %v3740_v1 }
  0x4b   : > { %1284 = vperm.xlu0 %3621, %v1121_v40   ;;  %1289 = vperm.xlu1 %3622, %v1122_v41  }
  0x4f   : > { %1294 = vperm.xlu0 %3621, %v1123_v43   ;;  %1299 = vperm.xlu1 %3622, %v1124_v44  }
  0x50   : > { %3317 = vmatmul.mubr.msk.bf16.gmra.mrb[24].mxu0 %vm690_vm1, %v3633_v42 }
  0x51   : > { %3320 = vmatprep.mubr.msk.bf16.mxu0 %vm3741_vm0, %v3740_v1 }
  0x53   : > { %1304 = vperm.xlu0 %3621, %v1125_v45   ;;  %1309 = vperm.xlu1 %3622, %v1126_v46  }
  0x57   : > { %1314 = vperm.xlu0 %3621, %v1127_v48   ;;  %1319 = vperm.xlu1 %3622, %v1128_v49  }
  0x58   : > { %3321 = vmatmul.mubr.msk.bf16.gmra.mrb[28].mxu0 %vm690_vm1, %v3634_v47 }
  0x59   : > { %3324 = vmatprep.mubr.msk.bf16.mxu0 %vm3741_vm0, %v3740_v1 }
  0x5b   : > { %1324 = vperm.xlu0 %3621, %v1129_v50   ;;  %1329 = vperm.xlu1 %3622, %v1130_v51  }
  0x5f   : > { %1179 = vperm.xlu0 %3621, %v1100_v53   ;;  %1229 = vperm.xlu1 %3622, %v1110_v54  }
  0x60   : > { %3325 = vmatmul.mubr.msk.bf16.gmra.mrb[32].mxu0 %vm690_vm1, %v3635_v52 }
  0x61   : > { %3328 = vmatprep.mubr.msk.bf16.mxu0 %vm3741_vm0, %v3740_v1 }
  0x63   : > { %1334 = vperm.xlu0 %3621, %v1131_v55  }
  0x68   : > { %3329 = vmatmul.mubr.msk.bf16.gmra.mrb[36].mxu0 %vm690_vm1, %v3636_v56 }
  0x69   : > { %3332 = vmatprep.mubr.msk.bf16.mxu0 %vm3741_vm0, %v3740_v1 }
  0x70   : > { %3333 = vmatmul.mubr.msk.bf16.gmra.mrb[40].mxu0 %vm690_vm1, %v3637_v57 }
  0x71   : > { %3336 = vmatprep.mubr.msk.bf16.mxu0 %vm3741_vm0, %v3740_v1 }
  0x78   : > { %3337 = vmatmul.mubr.msk.bf16.gmra.mrb[44].mxu0 %vm690_vm1, %v3638_v58 }
  0x79   : > { %3340 = vmatprep.mubr.msk.bf16.mxu0 %vm3741_vm0, %v3740_v1 }
  0x80   : > { %3341 = vmatmul.mubr.msk.bf16.gmra.mrb[48].mxu0 %vm690_vm1, %v3639_v59 }
  0x81   : > { %3344 = vmatprep.mubr.msk.bf16.mxu0 %vm3741_vm0, %v3740_v1 }
  0x88   : > { %3345 = vmatmul.mubr.msk.bf16.gmra.mrb[52].mxu0 %vm690_vm1, %v3640_v60 }
  0x89   : > { %3348 = vmatprep.mubr.msk.bf16.mxu0 %vm3741_vm0, %v3740_v1 }
  0x90   : > { %3349 = vmatmul.mubr.msk.bf16.gmra.mrb[56].mxu0 %vm690_vm1, %v3641_v61 }
  0x91   : > { %3352 = vmatprep.mubr.msk.bf16.mxu0 %vm3741_vm0, %v3740_v1 }
  0x92   : > { %v1135_v2 = vpop.permute.xlu0 %1134  ;;  %v1145_v13 = vpop.permute.xlu1 %1144 }
  0x96   : > { %v1140_v4 = vpop.permute.xlu0 %1139  ;;  %v1150_v16 = vpop.permute.xlu1 %1149 }
  0x98   : > { %3353 = vmatmul.mubr.msk.bf16.gmra.mrb[60].mxu0 %vm690_vm1, %v3642_v62 }
  0x99   : > { %3356 = vmatprep.mubr.msk.bf16.mxu0 %vm3741_vm0, %v3740_v1 }
  0x9a   : > { %v4101_v5 = vpop.permute.xlu0 %1154  ;;  %v4133_v18 = vpop.permute.xlu1 %1159 }
  0x9e   : > { %v4107_v7 = vpop.permute.xlu0 %1164  ;;  %v4137_v20 = vpop.permute.xlu1 %1184 }
  0xa0   : > { %3357 = vmatmul.mubr.msk.bf16.gmra.mrb[64].mxu0 %vm690_vm1, %v3643_v63 }
  0xa1   : > { %3360 = vmatprep.mubr.msk.bf16.mxu0 %vm3741_vm0, %v3740_v1 }
  0xa2   : > { %v4113_v10 = vpop.permute.xlu0 %1189  ;;  %v4141_v22 = vpop.permute.xlu1 %1194 }
  0xa6   : > { %v4145_v24 = vpop.permute.xlu1 %1174 }
  0xa8   : > { %3361 = vmatmul.mubr.msk.bf16.gmra.mrb[68].mxu0 %vm690_vm1, %v3644_v0 }
  0xa9   : > { %3364 = vmatprep.mubr.msk.bf16.mxu0 %vm3741_vm0, %v3740_v1 }
  0xaa   : > { %v4160_v31 = vpop.permute.xlu1 %1204 }
  0xae   : > { %v4167_v41 = vpop.permute.xlu1 %1214 }
  0xb0   : > { %3365 = vmatmul.mubr.msk.bf16.gmra.mrb[72].mxu0 %vm690_vm1, %v3645_v3 }
  0xb1   : > { %3368 = vmatprep.mubr.msk.bf16.mxu0 %vm3741_vm0, %v3740_v1 }
  0xb2   : > { %v4177_v53 = vpop.permute.xlu1 %1224 }
  0xb6   : > { %v4187_v3 = vpop.permute.xlu1 %1239 }
  0xb8   : > { %3369 = vmatmul.mubr.msk.bf16.gmra.mrb[76].mxu0 %vm690_vm1, %v3646_v6 }
  0xb9   : > { %3372 = vmatprep.mubr.msk.bf16.mxu0 %vm3741_vm0, %v3740_v1  ;;  %v4119_v1 = vpop.permute.xlu0 %1169 }
  0xbd   : > { %v4121_v12 = vpop.permute.xlu0 %1199 }
  0xc0   : > { %3373 = vmatmul.mubr.msk.bf16.gmra.mrb[80].mxu0 %vm690_vm1, %v3647_v8 }
  0xc1   : > { %v4123_v14 = vpop.permute.xlu0 %1209 }
  0xc5   : > { %v4131_v17 = vpop.permute.xlu0 %1219 }
  0xc9   : > { %v4135_v19 = vpop.permute.xlu0 %1234 }
  0xcd   : > { %v4139_v21 = vpop.permute.xlu0 %1244 }
  0xd1   : > { %v4143_v23 = vpop.permute.xlu0 %1254 }
  0xd5   : > { %v4147_v25 = vpop.permute.xlu0 %1264 }
  0xd9   : > { %v4162_v33 = vpop.permute.xlu0 %1274 }
  0xdd   : > { %v4169_v43 = vpop.permute.xlu0 %1284 }
  0xe1   : > { %v4179_v54 = vpop.permute.xlu0 %1294 }
  0xf3   : > { %v788_v27 = vpop.f32.mrb[0].mxu0 }
  0xf4   : > { %v961_v29 = vmul.f32 %v4152_v26, %v788_v27  ;;  %v3294_v30 = vpop.f32.mrb[1].mxu0 }
  0xf5   : > { %v791_v32 = vpop.f32.mrb[2].mxu0 }
  0xf6   : > { %v1009_v34 = vadd.f32 %v4157_v28, %v961_v29  ;;  %v962_v35 = vmul.f32 %v4152_v26, %v791_v32  ;;  %v3295_v36 = vpop.f32.mrb[3].mxu0  ;;  %v4198_v32 = vpop.permute.xlu1 %1249 }
  0xf8   : > { %v1050_v37 = vmax.f32 %v1009_v34, 0.0  ;;  %v1010_v38 = vadd.f32 %v4157_v28, %v962_v35 }
  0xfa   : > { %v1337_v39 = vmul.f32 %v1135_v2, %v1050_v37  ;;  %v1051_v40 = vmax.f32 %v1010_v38, 0.0 }
  0xfb   : > { %v796_v42 = vpop.f32.mrb[4].mxu0 }
  0xfc   : > { %1379 = vst.msk [vmem:[#allocation2] sm:$0xff] %vm1378_vm2, %v1337_v39  ;;  %v1338_v44 = vmul.f32 %v1140_v4, %v1051_v40  ;;  %v963_v45 = vmul.f32 %v4152_v26, %v796_v42  ;;  %v3298_v46 = vpop.f32.mrb[5].mxu0  ;;  %v4189_v4 = vpop.permute.xlu0 %1304 }
  0xfd   : > { %v799_v47 = vpop.f32.mrb[6].mxu0 }
  0xfe   : > { %1380 = vst.msk [vmem:[#allocation2 + $0x8] sm:$0xff] %vm1378_vm2, %v1338_v44  ;;  %v1011_v48 = vadd.f32 %v4157_v28, %v963_v45  ;;  %v964_v49 = vmul.f32 %v4152_v26, %v799_v47  ;;  %v3299_v50 = vpop.f32.mrb[7].mxu0  ;;  %v4213_v44 = vpop.permute.xlu1 %1259 }
 0x100   : > { %v1052_v51 = vmax.f32 %v1011_v48, 0.0  ;;  %v1012_v52 = vadd.f32 %v4157_v28, %v964_v49  ;;  %v4202_v35 = vpop.permute.xlu0 %1314 }
 0x102   : > { %v1339_v55 = vmul.f32 %v1145_v13, %v1052_v51  ;;  %v1053_v56 = vmax.f32 %v1012_v52, 0.0 }
 0x103   : > { %v804_v57 = vpop.f32.mrb[8].mxu0  ;;  %v1421_v58 = vld [vmem:[#allocation2] sm:$0xff] }
 0x104   : > { %1381 = vst.msk [vmem:[#allocation2 + $0x10] sm:$0xff] %vm1378_vm2, %v1339_v55  ;;  %v1340_v59 = vmul.f32 %v1150_v16, %v1053_v56  ;;  %v965_v60 = vmul.f32 %v4152_v26, %v804_v57  ;;  %v3302_v61 = vpop.f32.mrb[9].mxu0  ;;  %1422 = vst.msk [vmem:[#allocation3] sm:$0xff] %vm1378_vm2, %v1421_v58  ;;  %v4215_v46 = vpop.permute.xlu0 %1324 }
 0x105   : > { %v807_v62 = vpop.f32.mrb[10].mxu0  ;;  %v4232_v58 = vpop.permute.xlu1 %1269 }
 0x106   : > { %1382 = vst.msk [vmem:[#allocation2 + $0x18] sm:$0xff] %vm1378_vm2, %v1340_v59  ;;  %v1013_v63 = vadd.f32 %v4157_v28, %v965_v60  ;;  %v966_v0 = vmul.f32 %v4152_v26, %v807_v62  ;;  %v3303_v2 = vpop.f32.mrb[11].mxu0 }
 0x108   : > { %v1054_v6 = vmax.f32 %v1013_v63, 0.0  ;;  %v1014_v8 = vadd.f32 %v4157_v28, %v966_v0  ;;  %v1180_v59 = vpop.permute.xlu0 %1179 }
 0x10a   : > { %v1341_v9 = vmul.f32 %v4101_v5, %v1054_v6  ;;  %v1055_v11 = vmax.f32 %v1014_v8, 0.0 }
 0x10b   : > { %v812_v13 = vpop.f32.mrb[12].mxu0  ;;  %v4193_v16 = vld [vmem:[#allocation2 + $0x9] sm:$0xff] }
 0x10c   : > { %1383 = vst.msk [vmem:[#allocation2 + $0x20] sm:$0xff] %vm1378_vm2, %v1341_v9  ;;  %v1342_v27 = vmul.f32 %v4133_v18, %v1055_v11  ;;  %v967_v29 = vmul.f32 %v4152_v26, %v812_v13  ;;  %v3306_v30 = vpop.f32.mrb[13].mxu0  ;;  %1424 = vst.msk [vmem:[#allocation3 + $0x8] sm:$0xff] %vm1378_vm2, %v4193_v16 }
 0x10d   : > { %v815_v34 = vpop.f32.mrb[14].mxu0  ;;  %v4204_v5 = vld [vmem:[#allocation2 + $0x12] sm:$0xff] }
 0x10e   : > { %1384 = vst.msk [vmem:[#allocation2 + $0x28] sm:$0xff] %vm1378_vm2, %v1342_v27  ;;  %v1015_v36 = vadd.f32 %v4157_v28, %v967_v29  ;;  %v968_v37 = vmul.f32 %v4152_v26, %v815_v34  ;;  %v3307_v18 = vpop.f32.mrb[15].mxu0  ;;  %1426 = vst.msk [vmem:[#allocation3 + $0x10] sm:$0xff] %vm1378_vm2, %v4204_v5  ;;  %v4248_v27 = vpop.permute.xlu1 %1279 }
 0x110   : > { %v1056_v38 = vmax.f32 %v1015_v36, 0.0  ;;  %v1016_v39 = vadd.f32 %v4157_v28, %v968_v37 }
 0x112   : > { %v1343_v40 = vmul.f32 %v4107_v7, %v1056_v38  ;;  %v1057_v42 = vmax.f32 %v1016_v39, 0.0 }
 0x113   : > { %v820_v45 = vpop.f32.mrb[16].mxu0  ;;  %v4217_v47 = vld [vmem:[#allocation2 + $0x1b] sm:$0xff] }
 0x114   : > { %1385 = vst.msk [vmem:[#allocation2 + $0x30] sm:$0xff] %vm1378_vm2, %v1343_v40  ;;  %v1344_v48 = vmul.f32 %v4119_v1, %v1057_v42  ;;  %v969_v49 = vmul.f32 %v4152_v26, %v820_v45  ;;  %v3310_v50 = vpop.f32.mrb[17].mxu0  ;;  %1428 = vst.msk [vmem:[#allocation3 + $0x18] sm:$0xff] %vm1378_vm2, %v4217_v47  ;;  %v4259_v42 = vpop.permute.xlu1 %1289 }
 0x115   : > { %v823_v51 = vpop.f32.mrb[18].mxu0  ;;  %v4224_v7 = vld [vmem:[#allocation2 + $0x24] sm:$0xff] }
 0x116   : > { %1386 = vst.msk [vmem:[#allocation2 + $0x38] sm:$0xff] %vm1378_vm2, %v1344_v48  ;;  %v1017_v52 = vadd.f32 %v4157_v28, %v969_v49  ;;  %v970_v55 = vmul.f32 %v4152_v26, %v823_v51  ;;  %v3311_v56 = vpop.f32.mrb[19].mxu0  ;;  %1430 = vst.msk [vmem:[#allocation3 + $0x20] sm:$0xff] %vm1378_vm2, %v4224_v7 }
 0x118   : > { %v1058_v1 = vmax.f32 %v1017_v52, 0.0  ;;  %v1018_v57 = vadd.f32 %v4157_v28, %v970_v55  ;;  %v4266_v55 = vpop.permute.xlu1 %1299 }
 0x11a   : > { %v1345_v60 = vmul.f32 %v4145_v24, %v1058_v1  ;;  %v1059_v61 = vmax.f32 %v1018_v57, 0.0 }
 0x11b   : > { %v828_v62 = vpop.f32.mrb[20].mxu0  ;;  %v4235_v63 = vld [vmem:[#allocation2 + $0x2d] sm:$0xff] }
 0x11c   : > { %1387 = vst.msk [vmem:[#allocation2 + $0x40] sm:$0xff] %vm1378_vm2, %v1345_v60  ;;  %v1346_v0 = vmul.f32 %v1180_v59, %v1059_v61  ;;  %v971_v2 = vmul.f32 %v4152_v26, %v828_v62  ;;  %v3314_v6 = vpop.f32.mrb[21].mxu0  ;;  %1432 = vst.msk [vmem:[#allocation3 + $0x28] sm:$0xff] %vm1378_vm2, %v4235_v63  ;;  %v4271_v61 = vld [vmem:[#allocation3] sm:$0xff] }
 0x11d   : > { %v831_v8 = vpop.f32.mrb[22].mxu0  ;;  %v4241_v9 = vld [vmem:[#allocation2 + $0x36] sm:$0xff] }
 0x11e   : > { %1388 = vst.msk [vmem:[#allocation2 + $0x48] sm:$0xff] %vm1378_vm2, %v1346_v0  ;;  %v1019_v24 = vadd.f32 %v4157_v28, %v971_v2  ;;  %v972_v11 = vmul.f32 %v4152_v26, %v831_v8  ;;  %v3315_v13 = vpop.f32.mrb[23].mxu0  ;;  %1434 = vst.msk [vmem:[#allocation3 + $0x30] sm:$0xff] %vm1378_vm2, %v4241_v9 }
 0x120   : > { %v1060_v29 = vmax.f32 %v1019_v24, 0.0  ;;  %v1020_v30 = vadd.f32 %v4157_v28, %v972_v11 }
 0x122   : > { %v1347_v34 = vmul.f32 %v4137_v20, %v1060_v29  ;;  %v1061_v36 = vmax.f32 %v1020_v30, 0.0  ;;  %v4281_v29 = vld [vmem:[#allocation3 + $0x8] sm:$0xff] }
 0x123   : > { %v836_v37 = vpop.f32.mrb[24].mxu0  ;;  %v4252_v18 = vld [vmem:[#allocation2 + $0x3f] sm:$0xff] }
 0x124   : > { %1389 = vst.msk [vmem:[#allocation2 + $0x50] sm:$0xff] %vm1378_vm2, %v1347_v34  ;;  %v1348_v38 = vmul.f32 %v4113_v10, %v1061_v36  ;;  %v973_v39 = vmul.f32 %v4152_v26, %v836_v37  ;;  %v3318_v40 = vpop.f32.mrb[25].mxu0  ;;  %1436 = vst.msk [vmem:[#allocation3 + $0x38] sm:$0xff] %vm1378_vm2, %v4252_v18 }
 0x125   : > { %v839_v45 = vpop.f32.mrb[26].mxu0 }
 0x126   : > { %1390 = vst.msk [vmem:[#allocation2 + $0x58] sm:$0xff] %vm1378_vm2, %v1348_v38  ;;  %v1021_v20 = vadd.f32 %v4157_v28, %v973_v39  ;;  %v974_v48 = vmul.f32 %v4152_v26, %v839_v45  ;;  %v3319_v49 = vpop.f32.mrb[27].mxu0  ;;  %v1664_v38 = vld [vmem:[#allocation2 + $0x1] sm:$0xff] }
 0x128   : > { %v1062_v50 = vmax.f32 %v1021_v20, 0.0  ;;  %v1022_v51 = vadd.f32 %v4157_v28, %v974_v48 }
 0x12a   : > { %v1349_v10 = vmul.f32 %v4141_v22, %v1062_v50  ;;  %v1063_v52 = vmax.f32 %v1022_v51, 0.0 }
 0x12b   : > { %v844_v56 = vpop.f32.mrb[28].mxu0 }
 0x12c   : > { %1391 = vst.msk [vmem:[#allocation2 + $0x60] sm:$0xff] %vm1378_vm2, %v1349_v10  ;;  %v1350_v1 = vmul.f32 %v4121_v12, %v1063_v52  ;;  %v975_v57 = vmul.f32 %v4152_v26, %v844_v56  ;;  %v3322_v59 = vpop.f32.mrb[29].mxu0  ;;  %v4278_v12 = vpop.permute.xlu1 %1309  ;;  %v4304_v56 = vld [vmem:[#allocation2 + $0xa] sm:$0xff] }
 0x12d   : > { %v847_v60 = vpop.f32.mrb[30].mxu0  ;;  %v1453_v62 = vld [vmem:[#allocation2 + $0x51] sm:$0xff]  ;;  %v4306_v59 = vld [vmem:[#allocation3 + $0x18] sm:$0xff] }
 0x12e   : > { %1392 = vst.msk [vmem:[#allocation2 + $0x68] sm:$0xff] %vm1378_vm2, %v1350_v1  ;;  %v1023_v0 = vadd.f32 %v4157_v28, %v975_v57  ;;  %v976_v22 = vmul.f32 %v4152_v26, %v847_v60  ;;  %v3323_v2 = vpop.f32.mrb[31].mxu0  ;;  %1454 = vst.msk [vmem:[#allocation3] sm:$0xff] %vm1378_vm2, %v1453_v62 }
 0x130   : > { %v1064_v6 = vmax.f32 %v1023_v0, 0.0  ;;  %v1024_v8 = vadd.f32 %v4157_v28, %v976_v22  ;;  %v4300_v49 = vpop.permute.xlu1 %1319 }
 0x132   : > { %v1351_v24 = vmul.f32 %v4160_v31, %v1064_v6  ;;  %v1065_v11 = vmax.f32 %v1024_v8, 0.0  ;;  %v4290_v31 = vld [vmem:[#allocation3 + $0x10] sm:$0xff] }
 0x133   : > { %v852_v13 = vpop.f32.mrb[32].mxu0  ;;  %v4283_v30 = vld [vmem:[#allocation2 + $0x5a] sm:$0xff] }
 0x134   : > { %1393 = vst.msk [vmem:[#allocation2 + $0x70] sm:$0xff] %vm1378_vm2, %v1351_v24  ;;  %v1352_v34 = vmul.f32 %v4123_v14, %v1065_v11  ;;  %v977_v36 = vmul.f32 %v4152_v26, %v852_v13  ;;  %v3326_v37 = vpop.f32.mrb[33].mxu0  ;;  %1456 = vst.msk [vmem:[#allocation3 + $0x8] sm:$0xff] %vm1378_vm2, %v4283_v30  ;;  %v4319_v6 = vpop.permute.xlu1 %1329  ;;  %v4321_v11 = vld [vmem:[#allocation3 + $0x20] sm:$0xff] }
 0x135   : > { %v855_v39 = vpop.f32.mrb[34].mxu0  ;;  %v1469_v40 = vld [vmem:[#allocation3] sm:$0xff] }
 0x136   : > { %v4292_v45 = vld [vmem:[#allocation2 + $0x63] sm:$0xff]  ;;  %1394 = vst.msk [vmem:[#allocation2 + $0x78] sm:$0xff] %vm1378_vm2, %v1352_v34  ;;  %v1025_v20 = vadd.f32 %v4157_v28, %v977_v36  ;;  %v978_v48 = vmul.f32 %v4152_v26, %v855_v39  ;;  %v3327_v14 = vpop.f32.mrb[35].mxu0  ;;  %1665 = vst.msk [vmem:[#allocation3] sm:$0xff] %vm1378_vm2, %v1664_v38 }
 0x137   : > { %1458 = vst.msk [vmem:[#allocation3 + $0x10] sm:$0xff] %vm1378_vm2, %v4292_v45 }
 0x138   : > { %v1066_v50 = vmax.f32 %v1025_v20, 0.0  ;;  %v1026_v51 = vadd.f32 %v4157_v28, %v978_v48  ;;  %v4335_v20 = vld [vmem:[#allocation2 + $0x1c] sm:$0xff]  ;;  %v1230_v48 = vpop.permute.xlu1 %1229 }
 0x13a   : > { %v1353_v10 = vmul.f32 %v4167_v41, %v1066_v50  ;;  %v1067_v52 = vmax.f32 %v1026_v51, 0.0  ;;  %v4317_v41 = vld [vmem:[#allocation2 + $0x13] sm:$0xff] }
 0x13b   : > { %v860_v1 = vpop.f32.mrb[36].mxu0  ;;  %v1470_v57 = vld [vmem:[#allocation3 + $0x8] sm:$0xff] }
 0x13c   : > { %v4308_v60 = vld [vmem:[#allocation2 + $0x6c] sm:$0xff]  ;;  %1395 = vst.msk [vmem:[#allocation2 + $0x80] sm:$0xff] %vm1378_vm2, %v1353_v10  ;;  %v1354_v62 = vmul.f32 %v4131_v17, %v1067_v52  ;;  %v979_v0 = vmul.f32 %v4152_v26, %v860_v1  ;;  %v3330_v22 = vpop.f32.mrb[37].mxu0  ;;  %v1477_v2 = vpack.c.bf16 %v1470_v57, %v1469_v40  ;;  %1667 = vst.msk [vmem:[#allocation3 + $0x8] sm:$0xff] %vm1378_vm2, %v4304_v56 }
 0x13d   : > { %1460 = vst.msk [vmem:[#allocation3 + $0x18] sm:$0xff] %vm1378_vm2, %v4308_v60  ;;  %v863_v8 = vpop.f32.mrb[38].mxu0  ;;  %v4323_v13 = vld [vmem:[#allocation2 + $0x75] sm:$0xff] }
 0x13e   : > { %v1471_v24 = vld [vmem:[#allocation3 + $0x10] sm:$0xff]  ;;  %1396 = vst.msk [vmem:[#allocation2 + $0x88] sm:$0xff] %vm1378_vm2, %v1354_v62  ;;  %v1027_v17 = vadd.f32 %v4157_v28, %v979_v0  ;;  %v980_v34 = vmul.f32 %v4152_v26, %v863_v8  ;;  %v3331_v36 = vpop.f32.mrb[39].mxu0  ;;  %3380 = vmatprep.mubr.msk.bf16.mxu1 %vm1378_vm2, %v1477_v2  ;;  %1462 = vst.msk [vmem:[#allocation3 + $0x20] sm:$0xff] %vm1378_vm2, %v4323_v13  ;;  %v4337_v51 = vld [vmem:[#allocation3 + $0x28] sm:$0xff] }
 0x13f   : > { %1669 = vst.msk [vmem:[#allocation3 + $0x10] sm:$0xff] %vm1378_vm2, %v4317_v41  ;;  %v3651_v0 = vld [vmem:[%s4774_s4 + $0x8] sm:$0xff]   ;;  %v4352_v8 = vld [vmem:[#allocation3 + $0x30] sm:$0xff] }
 0x140   : > { %v1068_v37 = vmax.f32 %v1027_v17, 0.0  ;;  %v1028_v38 = vadd.f32 %v4157_v28, %v980_v34 }
 0x142   : > { %v1355_v39 = vmul.f32 %v4177_v53, %v1068_v37  ;;  %v1069_v40 = vmax.f32 %v1028_v38, 0.0  ;;  %v4347_v53 = vld [vmem:[#allocation2 + $0x25] sm:$0xff] }
 0x143   : > { %v868_v14 = vpop.f32.mrb[40].mxu0  ;;  %v4339_v10 = vld [vmem:[#allocation2 + $0x7e] sm:$0xff] }
 0x144   : > { %v1472_v50 = vld [vmem:[#allocation3 + $0x18] sm:$0xff]  ;;  %1397 = vst.msk [vmem:[#allocation2 + $0x90] sm:$0xff] %vm1378_vm2, %v1355_v39  ;;  %v1356_v52 = vmul.f32 %v1230_v48, %v1069_v40  ;;  %v981_v1 = vmul.f32 %v4152_v26, %v868_v14  ;;  %v3334_v57 = vpop.f32.mrb[41].mxu0  ;;  %1464 = vst.msk [vmem:[#allocation3 + $0x28] sm:$0xff] %vm1378_vm2, %v4339_v10  ;;  %v4372_v14 = vld [vmem:[#allocation2 + $0x2e] sm:$0xff] }
 0x145   : > { %v1478_v62 = vpack.c.bf16 %v1472_v50, %v1471_v24  ;;  %1671 = vst.msk [vmem:[#allocation3 + $0x18] sm:$0xff] %vm1378_vm2, %v4335_v20  ;;  %v871_v22 = vpop.f32.mrb[42].mxu0  ;;  %v1473_v2 = vld [vmem:[#allocation3 + $0x20] sm:$0xff]  ;;  %v4369_v39 = vld [vmem:[%s4774_s4 + $0x20] sm:$0xff]  }
 0x146   : > { %v4354_v17 = vld [vmem:[#allocation2 + $0x87] sm:$0xff]  ;;  %1398 = vst.msk [vmem:[#allocation2 + $0x98] sm:$0xff] %vm1378_vm2, %v1356_v52  ;;  %v1029_v24 = vadd.f32 %v4157_v28, %v981_v1  ;;  %v982_v34 = vmul.f32 %v4152_v26, %v871_v22  ;;  %v3335_v36 = vpop.f32.mrb[43].mxu0  ;;  %1673 = vst.msk [vmem:[#allocation3 + $0x20] sm:$0xff] %vm1378_vm2, %v4347_v53 }
 0x147   : > { %3381 = vmatmul.mubr.msk.bf16.vlgmr.msra.gmra.mrb[0].mxu1 %vm1378_vm2, %v1478_v62  ;;  %1466 = vst.msk [vmem:[#allocation3 + $0x30] sm:$0xff] %vm1378_vm2, %v4354_v17  ;;  %v4374_v1 = vld [vmem:[#allocation3 + $0x38] sm:$0xff]  ;;  %v4386_v36 = vld [vmem:[#allocation2 + $0x37] sm:$0xff] }
 0x148   : > { %3389 = vmatpush3.bf16.msra.mxu1 %v4128_v15  ;;  %v1070_v37 = vmax.f32 %v1029_v24, 0.0  ;;  %v1030_v38 = vadd.f32 %v4157_v28, %v982_v34 }
 0x149   : > { %3390 = vmatprep.subr.bf16.mxu1 %v3651_v0 }
 0x14a   : > { %v1357_v40 = vmul.f32 %v4135_v19, %v1070_v37  ;;  %v1071_v48 = vmax.f32 %v1030_v38, 0.0 }
 0x14b   : > { %v876_v50 = vpop.f32.mrb[44].mxu0  ;;  %v1474_v52 = vld [vmem:[#allocation3 + $0x28] sm:$0xff] }
 0x14c   : > { %v4376_v57 = vld [vmem:[#allocation2 + $0x90] sm:$0xff]  ;;  %3391 = vmatpush3.bf16.msra.mxu1 %v3651_v0  ;;  %1399 = vst.msk [vmem:[#allocation2 + $0xa0] sm:$0xff] %vm1378_vm2, %v1357_v40  ;;  %v1358_v15 = vmul.f32 %v4187_v3, %v1071_v48  ;;  %v983_v62 = vmul.f32 %v4152_v26, %v876_v50  ;;  %v3338_v22 = vpop.f32.mrb[45].mxu0  ;;  %v1479_v24 = vpack.c.bf16 %v1474_v52, %v1473_v2  ;;  %1675 = vst.msk [vmem:[#allocation3 + $0x28] sm:$0xff] %vm1378_vm2, %v4372_v14 }
 0x14d   : > { %1468 = vst.msk [vmem:[#allocation3 + $0x38] sm:$0xff] %vm1378_vm2, %v4376_v57  ;;  %3400 = vmatprep.subr.bf16.mxu1 %v4369_v39  ;;  %v879_v19 = vpop.f32.mrb[46].mxu0  ;;  %v4396_v22 = vld [vmem:[#allocation2 + $0x40] sm:$0xff] }
 0x14e   : > { %v1475_v34 = vld [vmem:[#allocation3 + $0x30] sm:$0xff]  ;;  %1400 = vst.msk [vmem:[#allocation2 + $0xa8] sm:$0xff] %vm1378_vm2, %v1358_v15  ;;  %v1031_v3 = vadd.f32 %v4157_v28, %v983_v62  ;;  %v984_v0 = vmul.f32 %v4152_v26, %v879_v19  ;;  %v3339_v37 = vpop.f32.mrb[47].mxu0  ;;  %3384 = vmatprep.mubr.msk.bf16.mxu1 %vm1378_vm2, %v1479_v24 }
 0x14f   : > { %1677 = vst.msk [vmem:[#allocation3 + $0x30] sm:$0xff] %vm1378_vm2, %v4386_v36 }
 0x150   : > { %v1072_v2 = vmax.f32 %v1031_v3, 0.0  ;;  %v1032_v38 = vadd.f32 %v4157_v28, %v984_v0  ;;  %v4405_v0 = vld [vmem:[#allocation3] sm:$0xff] }
 0x152   : > { %v1359_v40 = vmul.f32 %v4139_v21, %v1072_v2  ;;  %v1073_v48 = vmax.f32 %v1032_v38, 0.0  ;;  %v1445_v21 = vpack.c.bf16 %v4281_v29, %v4271_v61 }
 0x153   : > { %v884_v50 = vpop.f32.mrb[48].mxu0 }
 0x154   : > { %v1476_v52 = vld [vmem:[#allocation3 + $0x38] sm:$0xff]  ;;  %1401 = vst.msk [vmem:[#allocation2 + $0xb0] sm:$0xff] %vm1378_vm2, %v1359_v40  ;;  %v1360_v15 = vmul.f32 %v4198_v32, %v1073_v48  ;;  %v985_v62 = vmul.f32 %v4152_v26, %v884_v50  ;;  %v3342_v24 = vpop.f32.mrb[49].mxu0  ;;  %v1681_v50 = vld [vmem:[#allocation3 + $0x8] sm:$0xff] }
 0x155   : > { %v1480_v19 = vpack.c.bf16 %v1476_v52, %v1475_v34  ;;  %1679 = vst.msk [vmem:[#allocation3 + $0x38] sm:$0xff] %vm1378_vm2, %v4396_v22  ;;  %v887_v3 = vpop.f32.mrb[50].mxu0  ;;  %v1794_v37 = vld [vmem:[#allocation2 + $0xa2] sm:$0xff] }
 0x156   : > { %1402 = vst.msk [vmem:[#allocation2 + $0xb8] sm:$0xff] %vm1378_vm2, %v1360_v15  ;;  %v1033_v2 = vadd.f32 %v4157_v28, %v985_v62  ;;  %v986_v32 = vmul.f32 %v4152_v26, %v887_v3  ;;  %v3343_v38 = vpop.f32.mrb[51].mxu0  ;;  %1795 = vst.msk [vmem:[#allocation3] sm:$0xff] %vm1378_vm2, %v1794_v37  ;;  %v1682_v37 = vld [vmem:[#allocation3 + $0x10] sm:$0xff] }
 0x157   : > { %3385 = vmatmul.mubr.msk.bf16.gmra.mrb[4].mxu1 %vm1378_vm2, %v1480_v19  ;;  %v1446_v19 = vpack.c.bf16 %v4306_v59, %v4290_v31 }
 0x158   : > { %3392 = vmatprep.mubr.msk.bf16.mxu1 %vm1378_vm2, %v1445_v21  ;;  %v1074_v34 = vmax.f32 %v1033_v2, 0.0  ;;  %v1034_v40 = vadd.f32 %v4157_v28, %v986_v32  ;;  %v1447_v21 = vpack.c.bf16 %v4337_v51, %v4321_v11  ;;  %v3654_v11 = vld [vmem:[%s4774_s4 + $0x30] sm:$0xff]  }
 0x15a   : > { %v1361_v61 = vmul.f32 %v4143_v23, %v1074_v34  ;;  %v1075_v29 = vmax.f32 %v1034_v40, 0.0  ;;  %v3653_v23 = vld [vmem:[%s4774_s4 + $0x28] sm:$0xff]  }
 0x15b   : > { %v892_v48 = vpop.f32.mrb[52].mxu0  ;;  %v1796_v52 = vld [vmem:[#allocation2 + $0xab] sm:$0xff] }
 0x15c   : > { %1403 = vst.msk [vmem:[#allocation2 + $0xc0] sm:$0xff] %vm1378_vm2, %v1361_v61  ;;  %v1362_v15 = vmul.f32 %v4213_v44, %v1075_v29  ;;  %v987_v62 = vmul.f32 %v4152_v26, %v892_v48  ;;  %v3346_v24 = vpop.f32.mrb[53].mxu0  ;;  %1797 = vst.msk [vmem:[#allocation3 + $0x8] sm:$0xff] %vm1378_vm2, %v1796_v52  ;;  %v1683_v61 = vld [vmem:[#allocation3 + $0x18] sm:$0xff] }
 0x15d   : > { %v895_v3 = vpop.f32.mrb[54].mxu0  ;;  %v1798_v2 = vld [vmem:[#allocation2 + $0xb4] sm:$0xff]  ;;  %v1684_v24 = vld [vmem:[#allocation3 + $0x20] sm:$0xff] }
 0x15e   : > { %1404 = vst.msk [vmem:[#allocation2 + $0xc8] sm:$0xff] %vm1378_vm2, %v1362_v15  ;;  %v1035_v44 = vadd.f32 %v4157_v28, %v987_v62  ;;  %v988_v32 = vmul.f32 %v4152_v26, %v895_v3  ;;  %v3347_v38 = vpop.f32.mrb[55].mxu0  ;;  %1799 = vst.msk [vmem:[#allocation3 + $0x10] sm:$0xff] %vm1378_vm2, %v1798_v2  ;;  %v1448_v15 = vpack.c.bf16 %v4374_v1, %v4352_v8 }
 0x15f   : > { %3393 = vmatmul.mubr.msk.bf16.vlgmr.msra.gmra.mrb[0].mxu1 %vm1378_vm2, %v1446_v19 }
 0x160   : > { %3396 = vmatprep.mubr.msk.bf16.mxu1 %vm1378_vm2, %v1447_v21  ;;  %3401 = vmatpush3.bf16.msra.mxu1 %v4369_v39  ;;  %v1076_v31 = vmax.f32 %v1035_v44, 0.0  ;;  %v1036_v59 = vadd.f32 %v4157_v28, %v988_v32  ;;  %v1685_v21 = vld [vmem:[#allocation3 + $0x28] sm:$0xff] }
 0x161   : > { %3402 = vmatprep.subr.bf16.mxu1 %v3653_v23 }
 0x162   : > { %v1363_v51 = vmul.f32 %v4147_v25, %v1076_v31  ;;  %v1077_v34 = vmax.f32 %v1036_v59, 0.0  ;;  %v1688_v25 = vpack.c.bf16 %v1681_v50, %v4405_v0  ;;  %v1689_v59 = vpack.c.bf16 %v1683_v61, %v1682_v37 }
 0x163   : > { %v900_v40 = vpop.f32.mrb[56].mxu0  ;;  %v1800_v29 = vld [vmem:[#allocation2 + $0xbd] sm:$0xff] }
 0x164   : > { %3403 = vmatpush3.bf16.msra.mxu1 %v3653_v23  ;;  %1405 = vst.msk [vmem:[#allocation2 + $0xd0] sm:$0xff] %vm1378_vm2, %v1363_v51  ;;  %v1364_v48 = vmul.f32 %v4232_v58, %v1077_v34  ;;  %v989_v39 = vmul.f32 %v4152_v26, %v900_v40  ;;  %v3350_v52 = vpop.f32.mrb[57].mxu0  ;;  %1801 = vst.msk [vmem:[#allocation3 + $0x18] sm:$0xff] %vm1378_vm2, %v1800_v29  ;;  %v3655_v51 = vld [vmem:[%s4774_s4 + $0x38] sm:$0xff]  }
 0x165   : > { %3412 = vmatprep.subr.bf16.mxu1 %v3654_v11  ;;  %v903_v62 = vpop.f32.mrb[58].mxu0  ;;  %v1802_v19 = vld [vmem:[#allocation2 + $0xc6] sm:$0xff]  ;;  %v1686_v40 = vld [vmem:[#allocation3 + $0x30] sm:$0xff] }
 0x166   : > { %1406 = vst.msk [vmem:[#allocation2 + $0xd8] sm:$0xff] %vm1378_vm2, %v1364_v48  ;;  %v1037_v23 = vadd.f32 %v4157_v28, %v989_v39  ;;  %v990_v58 = vmul.f32 %v4152_v26, %v903_v62  ;;  %v3351_v3 = vpop.f32.mrb[59].mxu0  ;;  %1803 = vst.msk [vmem:[#allocation3 + $0x20] sm:$0xff] %vm1378_vm2, %v1802_v19  ;;  %v3656_v52 = vld [vmem:[%s4774_s4 + $0x40] sm:$0xff]  }
 0x167   : > { %3397 = vmatmul.mubr.msk.bf16.gmra.mrb[4].mxu1 %vm1378_vm2, %v1448_v15  ;;  %v1687_v15 = vld [vmem:[#allocation3 + $0x38] sm:$0xff] }
 0x168   : > { %3404 = vmatprep.mubr.msk.bf16.mxu1 %vm1378_vm2, %v1688_v25  ;;  %v1078_v8 = vmax.f32 %v1037_v23, 0.0  ;;  %v1038_v1 = vadd.f32 %v4157_v28, %v990_v58  ;;  %v1691_v3 = vpack.c.bf16 %v1687_v15, %v1686_v40 }
 0x16a   : > { %v1365_v0 = vmul.f32 %v4162_v33, %v1078_v8  ;;  %v1079_v50 = vmax.f32 %v1038_v1, 0.0  ;;  %v1690_v33 = vpack.c.bf16 %v1685_v21, %v1684_v24  ;;  %v1811_v24 = vld [vmem:[#allocation3 + $0x8] sm:$0xff]  ;;  %v1810_v8 = vld [vmem:[#allocation3] sm:$0xff] }
 0x16b   : > { %v908_v2 = vpop.f32.mrb[60].mxu0  ;;  %v1804_v44 = vld [vmem:[#allocation2 + $0xcf] sm:$0xff] }
 0x16c   : > { %1407 = vst.msk [vmem:[#allocation2 + $0xe0] sm:$0xff] %vm1378_vm2, %v1365_v0  ;;  %v1366_v32 = vmul.f32 %v4248_v27, %v1079_v50  ;;  %v991_v38 = vmul.f32 %v4152_v26, %v908_v2  ;;  %v3354_v31 = vpop.f32.mrb[61].mxu0  ;;  %1805 = vst.msk [vmem:[#allocation3 + $0x28] sm:$0xff] %vm1378_vm2, %v1804_v44  ;;  %v1818_v50 = vpack.c.bf16 %v1811_v24, %v1810_v8 }
 0x16d   : > { %v911_v34 = vpop.f32.mrb[62].mxu0  ;;  %v1806_v29 = vld [vmem:[#allocation2 + $0xd8] sm:$0xff] }
 0x16e   : > { %1408 = vst.msk [vmem:[#allocation2 + $0xe8] sm:$0xff] %vm1378_vm2, %v1366_v32  ;;  %v1039_v48 = vadd.f32 %v4157_v28, %v991_v38  ;;  %v992_v27 = vmul.f32 %v4152_v26, %v911_v34  ;;  %v3355_v39 = vpop.f32.mrb[63].mxu0  ;;  %1807 = vst.msk [vmem:[#allocation3 + $0x30] sm:$0xff] %vm1378_vm2, %v1806_v29  ;;  %v1813_v32 = vld [vmem:[#allocation3 + $0x18] sm:$0xff]  ;;  %v1812_v34 = vld [vmem:[#allocation3 + $0x10] sm:$0xff] }
 0x16f   : > { %3405 = vmatmul.mubr.msk.bf16.vlgmr.msra.gmra.mrb[0].mxu1 %vm1378_vm2, %v1689_v59  ;;  %v3657_v39 = vld [vmem:[%s4774_s4 + $0x48] sm:$0xff]  }
 0x170   : > { %3408 = vmatprep.mubr.msk.bf16.mxu1 %vm1378_vm2, %v1690_v33  ;;  %3413 = vmatpush3.bf16.msra.mxu1 %v3654_v11  ;;  %v1080_v37 = vmax.f32 %v1039_v48, 0.0  ;;  %v1040_v61 = vadd.f32 %v4157_v28, %v992_v27  ;;  %v1819_v48 = vpack.c.bf16 %v1813_v32, %v1812_v34  ;;  %v1814_v27 = vld [vmem:[#allocation3 + $0x20] sm:$0xff] }
 0x171   : > { %3414 = vmatprep.subr.bf16.mxu1 %v3655_v51 }
 0x172   : > { %v1367_v62 = vmul.f32 %v4169_v43, %v1080_v37  ;;  %v1081_v25 = vmax.f32 %v1040_v61, 0.0 }
 0x173   : > { %v916_v19 = vpop.f32.mrb[64].mxu0  ;;  %v1815_v59 = vld [vmem:[#allocation3 + $0x28] sm:$0xff] }
 0x174   : > { %3415 = vmatpush3.bf16.msra.mxu1 %v3655_v51  ;;  %1409 = vst.msk [vmem:[#allocation2 + $0xf0] sm:$0xff] %vm1378_vm2, %v1367_v62  ;;  %v1368_v23 = vmul.f32 %v4259_v42, %v1081_v25  ;;  %v993_v11 = vmul.f32 %v4152_v26, %v916_v19  ;;  %v3358_v58 = vpop.f32.mrb[65].mxu0  ;;  %v4498_v19 = vld [vmem:[%s4774_s4 + $0x50] sm:$0xff]  }
 0x175   : > { %3424 = vmatprep.subr.bf16.mxu1 %v3656_v52  ;;  %v919_v1 = vpop.f32.mrb[66].mxu0  ;;  %v1808_v0 = vld [vmem:[#allocation2 + $0xe1] sm:$0xff] }
 0x176   : > { %1410 = vst.msk [vmem:[#allocation2 + $0xf8] sm:$0xff] %vm1378_vm2, %v1368_v23  ;;  %v1041_v43 = vadd.f32 %v4157_v28, %v993_v11  ;;  %v994_v21 = vmul.f32 %v4152_v26, %v919_v1  ;;  %v3359_v2 = vpop.f32.mrb[67].mxu0  ;;  %1809 = vst.msk [vmem:[#allocation3 + $0x38] sm:$0xff] %vm1378_vm2, %v1808_v0  ;;  %v1816_v1 = vld [vmem:[#allocation3 + $0x30] sm:$0xff] }
 0x177   : > { %3409 = vmatmul.mubr.msk.bf16.gmra.mrb[4].mxu1 %vm1378_vm2, %v1691_v3 }
 0x178   : > { %3416 = vmatprep.mubr.msk.bf16.mxu1 %vm1378_vm2, %v1818_v50  ;;  %v1082_v42 = vmax.f32 %v1041_v43, 0.0  ;;  %v1042_v44 = vadd.f32 %v4157_v28, %v994_v21 }
 0x17a   : > { %v1369_v38 = vmul.f32 %v4179_v54, %v1082_v42  ;;  %v1083_v31 = vmax.f32 %v1042_v44, 0.0  ;;  %v1820_v54 = vpack.c.bf16 %v1815_v59, %v1814_v27  ;;  %v2054_v42 = vld [vmem:[#allocation2 + $0xa3] sm:$0xff] }
 0x17b   : > { %v924_v51 = vpop.f32.mrb[68].mxu0 }
 0x17c   : > { %1411 = vst.msk [vmem:[#allocation2 + $0x100] sm:$0xff] %vm1378_vm2, %v1369_v38  ;;  %v1370_v33 = vmul.f32 %v4266_v55, %v1083_v31  ;;  %v995_v40 = vmul.f32 %v4152_v26, %v924_v51  ;;  %v3362_v29 = vpop.f32.mrb[69].mxu0 }
 0x17d   : > { %v1924_v37 = vld [vmem:[#allocation2 + $0xf3] sm:$0xff]  ;;  %v927_v61 = vpop.f32.mrb[70].mxu0  ;;  %v1817_v23 = vld [vmem:[#allocation3 + $0x38] sm:$0xff] }
 0x17e   : > { %1412 = vst.msk [vmem:[#allocation2 + $0x108] sm:$0xff] %vm1378_vm2, %v1370_v33  ;;  %1925 = vst.msk [vmem:[#allocation3] sm:$0xff] %vm1378_vm2, %v1924_v37  ;;  %v1043_v15 = vadd.f32 %v4157_v28, %v995_v40  ;;  %v996_v55 = vmul.f32 %v4152_v26, %v927_v61  ;;  %v3363_v62 = vpop.f32.mrb[71].mxu0  ;;  %v1821_v43 = vpack.c.bf16 %v1817_v23, %v1816_v1  ;;  %v2056_v29 = vld [vmem:[#allocation2 + $0xac] sm:$0xff]  ;;  %v2058_v61 = vld [vmem:[#allocation2 + $0xb5] sm:$0xff] }
 0x17f   : > { %3417 = vmatmul.mubr.msk.bf16.vlgmr.msra.gmra.mrb[0].mxu1 %vm1378_vm2, %v1819_v48 }
 0x180   : > { %3420 = vmatprep.mubr.msk.bf16.mxu1 %vm1378_vm2, %v1820_v54  ;;  %3425 = vmatpush3.bf16.msra.mxu1 %v3656_v52  ;;  %v1084_v25 = vmax.f32 %v1043_v15, 0.0  ;;  %v1044_v24 = vadd.f32 %v4157_v28, %v996_v55 }
 0x181   : > { %3426 = vmatprep.subr.bf16.mxu1 %v3657_v39 }
 0x182   : > { %v1371_v11 = vmul.f32 %v4189_v4, %v1084_v25  ;;  %v1085_v58 = vmax.f32 %v1044_v24, 0.0 }
 0x183   : > { %v1926_v3 = vld [vmem:[#allocation2 + $0xfc] sm:$0xff]  ;;  %v932_v8 = vpop.f32.mrb[72].mxu0 }
 0x184   : > { %3427 = vmatpush3.bf16.msra.mxu1 %v3657_v39  ;;  %1927 = vst.msk [vmem:[#allocation3 + $0x8] sm:$0xff] %vm1378_vm2, %v1926_v3  ;;  %1413 = vst.msk [vmem:[#allocation2 + $0x110] sm:$0xff] %vm1378_vm2, %v1371_v11  ;;  %v1372_v52 = vmul.f32 %v4278_v12, %v1085_v58  ;;  %v997_v0 = vmul.f32 %v4152_v26, %v932_v8  ;;  %v3366_v50 = vpop.f32.mrb[73].mxu0  ;;  %v2060_v3 = vld [vmem:[#allocation2 + $0xbe] sm:$0xff] }
 0x185   : > { %3436 = vmatprep.subr.bf16.mxu1 %v4498_v19  ;;  %v1928_v21 = vld [vmem:[#allocation2 + $0x105] sm:$0xff]  ;;  %v935_v2 = vpop.f32.mrb[74].mxu0 }
 0x186   : > { %v1940_v4 = vld [vmem:[#allocation3] sm:$0xff]  ;;  %1414 = vst.msk [vmem:[#allocation2 + $0x118] sm:$0xff] %vm1378_vm2, %v1372_v52  ;;  %1929 = vst.msk [vmem:[#allocation3 + $0x10] sm:$0xff] %vm1378_vm2, %v1928_v21  ;;  %v1045_v44 = vadd.f32 %v4157_v28, %v997_v0  ;;  %v998_v32 = vmul.f32 %v4152_v26, %v935_v2  ;;  %v3367_v38 = vpop.f32.mrb[75].mxu0 }
 0x187   : > { %3421 = vmatmul.mubr.msk.bf16.gmra.mrb[4].mxu1 %vm1378_vm2, %v1821_v43  ;;  %2055 = vst.msk [vmem:[#allocation3] sm:$0xff] %vm1378_vm2, %v2054_v42  ;;  %v1335_v42 = vpop.permute.xlu0 %1334 }
 0x188   : > { %v1086_v12 = vmax.f32 %v1045_v44, 0.0  ;;  %v1046_v31 = vadd.f32 %v4157_v28, %v998_v32  ;;  %v2064_v44 = vld [vmem:[#allocation2 + $0xd0] sm:$0xff]  ;;  %v3667_v42 = vld [vmem:[%s4775_s5 + $0x8] sm:$0xff]  }
 0x18a   : > { %v1373_v59 = vmul.f32 %v4202_v35, %v1086_v12  ;;  %v1087_v51 = vmax.f32 %v1046_v31, 0.0 }
 0x18b   : > { %v1930_v34 = vld [vmem:[#allocation2 + $0x10e] sm:$0xff]  ;;  %v940_v33 = vpop.f32.mrb[76].mxu0 }
 0x18c   : > { %v1941_v40 = vld [vmem:[#allocation3 + $0x8] sm:$0xff]  ;;  %1931 = vst.msk [vmem:[#allocation3 + $0x18] sm:$0xff] %vm1378_vm2, %v1930_v34  ;;  %1415 = vst.msk [vmem:[#allocation2 + $0x120] sm:$0xff] %vm1378_vm2, %v1373_v59  ;;  %v1374_v48 = vmul.f32 %v4300_v49, %v1087_v51  ;;  %v999_v27 = vmul.f32 %v4152_v26, %v940_v33  ;;  %v3370_v39 = vpop.f32.mrb[77].mxu0  ;;  %v2066_v51 = vld [vmem:[#allocation2 + $0xd9] sm:$0xff] }
 0x18d   : > { %v1948_v37 = vpack.c.bf16 %v1941_v40, %v1940_v4  ;;  %2057 = vst.msk [vmem:[#allocation3 + $0x8] sm:$0xff] %vm1378_vm2, %v2056_v29  ;;  %v1932_v54 = vld [vmem:[#allocation2 + $0x117] sm:$0xff]  ;;  %v943_v35 = vpop.f32.mrb[78].mxu0  ;;  %v3660_v4 = vld [vmem:[%s4774_s4 + $0x60] sm:$0xff]  }
 0x18e   : > { %v1942_v15 = vld [vmem:[#allocation3 + $0x10] sm:$0xff]  ;;  %v4519_v55 = vld [vmem:[#allocation3] sm:$0xff]  ;;  %1933 = vst.msk [vmem:[#allocation3 + $0x20] sm:$0xff] %vm1378_vm2, %v1932_v54  ;;  %1416 = vst.msk [vmem:[#allocation2 + $0x128] sm:$0xff] %vm1378_vm2, %v1374_v48  ;;  %v1047_v62 = vadd.f32 %v4157_v28, %v999_v27  ;;  %v1000_v49 = vmul.f32 %v4152_v26, %v943_v35  ;;  %v3371_v25 = vpop.f32.mrb[79].mxu0 }
 0x18f   : > { %3428 = vmatprep.mubr.msk.bf16.mxu1 %vm1378_vm2, %v1948_v37  ;;  %2059 = vst.msk [vmem:[#allocation3 + $0x10] sm:$0xff] %vm1378_vm2, %v2058_v61  ;;  %2185 = vst.msk [vmem:[#allocation3] sm:$0xff] %vm1378_vm2, %v4193_v16  ;;  %v2062_v16 = vld [vmem:[#allocation2 + $0xc7] sm:$0xff]  ;;  %v2328_v35 = vld [vmem:[#allocation2 + $0x99] sm:$0xff] }
 0x190   : > { %v1088_v24 = vmax.f32 %v1047_v62, 0.0  ;;  %v1048_v23 = vadd.f32 %v4157_v28, %v1000_v49  ;;  %v3659_v28 = vld [vmem:[%s4774_s4 + $0x58] sm:$0xff]   ;;  %v2068_v40 = vld [vmem:[#allocation2 + $0xe2] sm:$0xff] }
 0x191   : > { %v3661_v61 = vld [vmem:[%s4774_s4 + $0x68] sm:$0xff]   ;;  %v3663_v25 = vld [vmem:[%s4774_s4 + $0x78] sm:$0xff]  }
 0x192   : > { %v1375_v11 = vmul.f32 %v4215_v46, %v1088_v24  ;;  %v1089_v58 = vmax.f32 %v1048_v23, 0.0 }
 0x193   : > { %v948_v8 = vpop.f32.mrb[80].mxu0  ;;  %v1943_v1 = vld [vmem:[#allocation3 + $0x18] sm:$0xff] }
 0x194   : > { %v1934_v52 = vld [vmem:[#allocation2 + $0x120] sm:$0xff]  ;;  %v4531_v0 = vld [vmem:[#allocation3 + $0x8] sm:$0xff]  ;;  %1417 = vst.msk [vmem:[#allocation2 + $0x130] sm:$0xff] %vm1378_vm2, %v1375_v11  ;;  %v1376_v26 = vmul.f32 %v4319_v6, %v1089_v58  ;;  %v1949_v50 = vpack.c.bf16 %v1943_v1, %v1942_v15  ;;  %2061 = vst.msk [vmem:[#allocation3 + $0x18] sm:$0xff] %vm1378_vm2, %v2060_v3  ;;  %v3374_v46 = vpop.f32.mrb[81].mxu0 }
 0x195   : > { %1935 = vst.msk [vmem:[#allocation3 + $0x28] sm:$0xff] %vm1378_vm2, %v1934_v52  ;;  %2187 = vst.msk [vmem:[#allocation3 + $0x8] sm:$0xff] %vm1378_vm2, %v4204_v5  ;;  %v1944_v43 = vld [vmem:[#allocation3 + $0x20] sm:$0xff]  ;;  %v951_v6 = vpop.f32.mrb[82].mxu0  ;;  %v3666_v1 = vld [vmem:[%s4775_s5] sm:$0xff]  }
 0x196   : > { %v4542_v21 = vld [vmem:[#allocation3 + $0x10] sm:$0xff]  ;;  %v4544_v2 = vld [vmem:[#allocation3] sm:$0xff]  ;;  %1418 = vst.msk [vmem:[#allocation2 + $0x138] sm:$0xff] %vm1378_vm2, %v1376_v26  ;;  %3429 = vmatmul.mubr.msk.bf16.vlgmr.msra.gmra.mrb[0].mxu1 %vm1378_vm2, %v1949_v50  ;;  %2063 = vst.msk [vmem:[#allocation3 + $0x20] sm:$0xff] %vm1378_vm2, %v2062_v16  ;;  %v3375_v5 = vpop.f32.mrb[83].mxu0 }
 0x197   : > { %2189 = vst.msk [vmem:[#allocation3 + $0x10] sm:$0xff] %vm1378_vm2, %v4217_v47  ;;  %2315 = vst.msk [vmem:[#allocation3] sm:$0xff] %vm1378_vm2, %v4283_v30  ;;  %3437 = vmatpush3.bf16.msra.mxu1 %v4498_v19  ;;  %v3665_v3 = vld [vmem:[%s4774_s4 + $0x88] sm:$0xff]  }
 0x198   : > { %3438 = vmatprep.subr.bf16.mxu1 %v3659_v28 }
 0x19b   : > { %v1936_v38 = vld [vmem:[#allocation2 + $0x129] sm:$0xff]  ;;  %3439 = vmatpush3.bf16.msra.mxu1 %v3659_v28  ;;  %v2073_v12 = vld [vmem:[#allocation3 + $0x18] sm:$0xff] }
 0x19c   : > { %v1945_v32 = vld [vmem:[#allocation3 + $0x28] sm:$0xff]  ;;  %1937 = vst.msk [vmem:[#allocation3 + $0x30] sm:$0xff] %vm1378_vm2, %v1936_v38  ;;  %3448 = vmatprep.subr.bf16.mxu1 %v3660_v4  ;;  %2191 = vst.msk [vmem:[#allocation3 + $0x18] sm:$0xff] %vm1378_vm2, %v4224_v7  ;;  %v2079_v37 = vpack.c.bf16 %v2073_v12, %v4542_v21  ;;  %v3161_v12 = vld [vmem:[%s4779_s9] ss:$0 sm:$0xff] }
 0x19d   : > { %v1950_v31 = vpack.c.bf16 %v1945_v32, %v1944_v43  ;;  %2065 = vst.msk [vmem:[#allocation3 + $0x28] sm:$0xff] %vm1378_vm2, %v2064_v44  ;;  %v4561_v47 = vld [vmem:[#allocation3 + $0x8] sm:$0xff]  ;;  %v2074_v19 = vld [vmem:[#allocation3 + $0x20] sm:$0xff]  ;;  %v3668_v44 = vld [vmem:[%s4782_s12] sm:$0xff]  }
 0x19e   : > { %v1938_v30 = vld [vmem:[#allocation2 + $0x132] sm:$0xff]  ;;  %2317 = vst.msk [vmem:[#allocation3 + $0x8] sm:$0xff] %vm1378_vm2, %v4292_v45  ;;  %2193 = vst.msk [vmem:[#allocation3 + $0x20] sm:$0xff] %vm1378_vm2, %v4235_v63  ;;  %v4573_v7 = vld [vmem:[#allocation3] sm:$0xff] }
 0x19f   : > { %v4565_v59 = vld [vmem:[#allocation3 + $0x10] sm:$0xff]  ;;  %3432 = vmatprep.mubr.msk.bf16.mxu1 %vm1378_vm2, %v1950_v31  ;;  %1939 = vst.msk [vmem:[#allocation3 + $0x38] sm:$0xff] %vm1378_vm2, %v1938_v30  ;;  %2445 = vst.msk [vmem:[#allocation3] sm:$0xff] %vm1378_vm2, %v4304_v56  ;;  %v3160_v32 = vld [vmem:[%s4778_s8] ss:$0 sm:$0xff] }
 0x1a0   : > { %2319 = vst.msk [vmem:[#allocation3 + $0x10] sm:$0xff] %vm1378_vm2, %v4308_v60 }
 0x1a3   : > { %v1946_v34 = vld [vmem:[#allocation3 + $0x30] sm:$0xff]  ;;  %v2203_v33 = vld [vmem:[#allocation3 + $0x18] sm:$0xff] }
 0x1a4   : > { %v2075_v45 = vld [vmem:[#allocation3 + $0x28] sm:$0xff]  ;;  %2067 = vst.msk [vmem:[#allocation3 + $0x30] sm:$0xff] %vm1378_vm2, %v2066_v51  ;;  %2321 = vst.msk [vmem:[#allocation3 + $0x18] sm:$0xff] %vm1378_vm2, %v4323_v13  ;;  %v2209_v49 = vpack.c.bf16 %v2203_v33, %v4565_v59 }
 0x1a5   : > { %2195 = vst.msk [vmem:[#allocation3 + $0x28] sm:$0xff] %vm1378_vm2, %v4241_v9  ;;  %v4582_v63 = vld [vmem:[#allocation3 + $0x8] sm:$0xff]  ;;  %v2204_v29 = vld [vmem:[#allocation3 + $0x20] sm:$0xff]  ;;  %v2078_v9 = vpack.c.bf16 %v4531_v0, %v4519_v55  ;;  %v2208_v55 = vpack.c.bf16 %v4561_v47, %v4544_v2 }
 0x1a6   : > { %v1947_v60 = vld [vmem:[#allocation3 + $0x38] sm:$0xff]  ;;  %2447 = vst.msk [vmem:[#allocation3 + $0x8] sm:$0xff] %vm1378_vm2, %v4317_v41  ;;  %2323 = vst.msk [vmem:[#allocation3 + $0x20] sm:$0xff] %vm1378_vm2, %v4339_v10  ;;  %v2198_v10 = vld [vmem:[#allocation2 + $0x48] sm:$0xff]  ;;  %v2338_v11 = vpack.c.bf16 %v4582_v63, %v4573_v7 }
 0x1a7   : > { %v4586_v56 = vld [vmem:[#allocation3 + $0x10] sm:$0xff]  ;;  %v1951_v48 = vpack.c.bf16 %v1947_v60, %v1946_v34  ;;  %2069 = vst.msk [vmem:[#allocation3 + $0x38] sm:$0xff] %vm1378_vm2, %v2068_v40  ;;  %v2460_v26 = vld [vmem:[#allocation3] sm:$0xff] }
 0x1a8   : > { %2449 = vst.msk [vmem:[#allocation3 + $0x10] sm:$0xff] %vm1378_vm2, %v4335_v20 }
 0x1a9   : > { %3433 = vmatmul.mubr.msk.bf16.gmra.mrb[4].mxu1 %vm1378_vm2, %v1951_v48 }
 0x1aa   : > { %3440 = vmatprep.mubr.msk.bf16.mxu1 %vm1378_vm2, %v2078_v9 }
 0x1ab   : > { %v2076_v13 = vld [vmem:[#allocation3 + $0x30] sm:$0xff]  ;;  %v2333_v27 = vld [vmem:[#allocation3 + $0x18] sm:$0xff] }
 0x1ac   : > { %v2205_v41 = vld [vmem:[#allocation3 + $0x28] sm:$0xff]  ;;  %2197 = vst.msk [vmem:[#allocation3 + $0x30] sm:$0xff] %vm1378_vm2, %v4252_v18  ;;  %2451 = vst.msk [vmem:[#allocation3 + $0x18] sm:$0xff] %vm1378_vm2, %v4347_v53  ;;  %v2080_v18 = vpack.c.bf16 %v2075_v45, %v2074_v19  ;;  %v2339_v58 = vpack.c.bf16 %v2333_v27, %v4586_v56 }
 0x1ad   : > { %2325 = vst.msk [vmem:[#allocation3 + $0x28] sm:$0xff] %vm1378_vm2, %v4354_v17  ;;  %v2334_v39 = vld [vmem:[#allocation3 + $0x20] sm:$0xff]  ;;  %v3662_v53 = vld [vmem:[%s4774_s4 + $0x70] sm:$0xff]   ;;  %v2210_v24 = vpack.c.bf16 %v2205_v41, %v2204_v29 }
 0x1ae   : > { %v2077_v20 = vld [vmem:[#allocation3 + $0x38] sm:$0xff]  ;;  %2453 = vst.msk [vmem:[#allocation3 + $0x20] sm:$0xff] %vm1378_vm2, %v4372_v14  ;;  %v2461_v52 = vld [vmem:[#allocation3 + $0x8] sm:$0xff] }
 0x1af   : > { %2199 = vst.msk [vmem:[#allocation3 + $0x38] sm:$0xff] %vm1378_vm2, %v2198_v10  ;;  %v2081_v15 = vpack.c.bf16 %v2077_v20, %v2076_v13  ;;  %v2468_v50 = vpack.c.bf16 %v2461_v52, %v2460_v26  ;;  %v2462_v46 = vld [vmem:[#allocation3 + $0x10] sm:$0xff] }
 0x1b1   : > { %3441 = vmatmul.mubr.msk.bf16.vlgmr.msra.gmra.mrb[0].mxu1 %vm1378_vm2, %v2079_v37 }
 0x1b2   : > { %3449 = vmatpush3.bf16.msra.mxu1 %v3660_v4  ;;  %3444 = vmatprep.mubr.msk.bf16.mxu1 %vm1378_vm2, %v2080_v18  ;;  %v3669_v18 = vld [vmem:[%s4782_s12 + $0x8] sm:$0xff]  }
 0x1b3   : > { %3450 = vmatprep.subr.bf16.mxu1 %v3661_v61  ;;  %v2206_v17 = vld [vmem:[#allocation3 + $0x30] sm:$0xff]  ;;  %v2463_v16 = vld [vmem:[#allocation3 + $0x18] sm:$0xff] }
 0x1b4   : > { %v2335_v54 = vld [vmem:[#allocation3 + $0x28] sm:$0xff]  ;;  %2327 = vst.msk [vmem:[#allocation3 + $0x30] sm:$0xff] %vm1378_vm2, %v4376_v57  ;;  %v2469_v43 = vpack.c.bf16 %v2463_v16, %v2462_v46  ;;  %v3168_v16 = vld [vmem:[%s4780_s10] ss:$0 sm:$0xff] }
 0x1b5   : > { %2455 = vst.msk [vmem:[#allocation3 + $0x28] sm:$0xff] %vm1378_vm2, %v4386_v36  ;;  %v2458_v36 = vld [vmem:[#allocation2 + $0x49] sm:$0xff]  ;;  %v2340_v8 = vpack.c.bf16 %v2335_v54, %v2334_v39 }
 0x1b6   : > { %3451 = vmatpush3.bf16.msra.mxu1 %v3661_v61  ;;  %v2207_v14 = vld [vmem:[#allocation3 + $0x38] sm:$0xff]  ;;  %v2464_v21 = vld [vmem:[#allocation3 + $0x20] sm:$0xff] }
 0x1b7   : > { %3460 = vmatprep.subr.bf16.mxu1 %v3662_v53  ;;  %2329 = vst.msk [vmem:[#allocation3 + $0x38] sm:$0xff] %vm1378_vm2, %v2328_v35  ;;  %v2211_v23 = vpack.c.bf16 %v2207_v14, %v2206_v17 }
 0x1b9   : > { %3445 = vmatmul.mubr.msk.bf16.gmra.mrb[4].mxu1 %vm1378_vm2, %v2081_v15 }
 0x1ba   : > { %3452 = vmatprep.mubr.msk.bf16.mxu1 %vm1378_vm2, %v2208_v55  ;;  %v3670_v55 = vld [vmem:[%s4782_s12 + $0x10] sm:$0xff]  }
 0x1bb   : > { %v2336_v62 = vld [vmem:[#allocation3 + $0x30] sm:$0xff] }
 0x1bc   : > { %2457 = vst.msk [vmem:[#allocation3 + $0x30] sm:$0xff] %vm1378_vm2, %v4396_v22  ;;  %v3664_v22 = vld [vmem:[%s4774_s4 + $0x80] sm:$0xff]   ;;  %v2465_v28 = vld [vmem:[#allocation3 + $0x28] sm:$0xff] }
 0x1bd   : > { %v2470_v2 = vpack.c.bf16 %v2465_v28, %v2464_v21  ;;  %v3182_v28 = vld [vmem:[%s4783_s13] ss:$0 sm:$0xff] }
 0x1be   : > { %v2337_v57 = vld [vmem:[#allocation3 + $0x38] sm:$0xff] }
 0x1bf   : > { %2459 = vst.msk [vmem:[#allocation3 + $0x38] sm:$0xff] %vm1378_vm2, %v2458_v36  ;;  %v2341_v0 = vpack.c.bf16 %v2337_v57, %v2336_v62 }
 0x1c1   : > { %3453 = vmatmul.mubr.msk.bf16.vlgmr.msra.gmra.mrb[0].mxu1 %vm1378_vm2, %v2209_v49 }
 0x1c2   : > { %3461 = vmatpush3.bf16.msra.mxu1 %v3662_v53  ;;  %3456 = vmatprep.mubr.msk.bf16.mxu1 %vm1378_vm2, %v2210_v24  ;;  %v3671_v24 = vld [vmem:[%s4782_s12 + $0x18] sm:$0xff]  }
 0x1c3   : > { %3462 = vmatprep.subr.bf16.mxu1 %v3663_v25  ;;  %v2466_v5 = vld [vmem:[#allocation3 + $0x30] sm:$0xff] }
 0x1c6   : > { %3463 = vmatpush3.bf16.msra.mxu1 %v3663_v25  ;;  %v2467_v6 = vld [vmem:[#allocation3 + $0x38] sm:$0xff] }
 0x1c7   : > { %3472 = vmatprep.subr.bf16.mxu1 %v3664_v22  ;;  %v2471_v4 = vpack.c.bf16 %v2467_v6, %v2466_v5  ;;  %v3672_v25 = vld [vmem:[%s4664_s26] sm:$0xff]  }
 0x1c8   : > { %v3183_v6 = vld [vmem:[%s4784_s14] ss:$0 sm:$0xff] }
 0x1c9   : > { %3457 = vmatmul.mubr.msk.bf16.gmra.mrb[4].mxu1 %vm1378_vm2, %v2211_v23  ;;  %v3674_v23 = vld [vmem:[%s4664_s26 + $0x10] sm:$0xff]  }
 0x1ca   : > { %3464 = vmatprep.mubr.msk.bf16.mxu1 %vm1378_vm2, %v2338_v11  ;;  %v3675_v11 = vld [vmem:[%s4664_s26 + $0x18] sm:$0xff]  }
 0x1d1   : > { %3465 = vmatmul.mubr.msk.bf16.vlgmr.msra.gmra.mrb[0].mxu1 %vm1378_vm2, %v2339_v58 }
 0x1d2   : > { %3473 = vmatpush3.bf16.msra.mxu1 %v3664_v22  ;;  %3468 = vmatprep.mubr.msk.bf16.mxu1 %vm1378_vm2, %v2340_v8  ;;  %v3673_v22 = vld [vmem:[%s4664_s26 + $0x8] sm:$0xff]   ;;  %s4720_s26 = scalar_lea.hbm %s4785_s15, %s3190_s29 }
 0x1d3   : > { %3474 = vmatprep.subr.bf16.mxu1 %v3665_v3 }
 0x1d6   : > { %3475 = vmatpush3.bf16.msra.mxu1 %v3665_v3 }
 0x1d7   : > { %3484 = vmatprep.subr.bf16.mxu1 %v3666_v1 }
 0x1d9   : > { %3469 = vmatmul.mubr.msk.bf16.gmra.mrb[4].mxu1 %vm1378_vm2, %v2341_v0 }
 0x1da   : > { %3476 = vmatprep.mubr.msk.bf16.mxu1 %vm1378_vm2, %v2468_v50 }
 0x1e1   : > { %3477 = vmatmul.mubr.msk.bf16.vlgmr.msra.gmra.mrb[0].mxu1 %vm1378_vm2, %v2469_v43  ;;  %v3169_v43 = vld [vmem:[%s4781_s11] ss:$0 sm:$0xff] }
 0x1e2   : > { %3480 = vmatprep.mubr.msk.bf16.mxu1 %vm1378_vm2, %v2470_v2  ;;  %3485 = vmatpush3.bf16.msra.mxu1 %v3666_v1 }
 0x1e3   : > { %3486 = vmatprep.subr.bf16.mxu1 %v3667_v42 }
 0x1e6   : > { %3487 = vmatpush3.bf16.msra.mxu1 %v3667_v42 }
 0x1e7   : > { %3496 = vmatprep.subr.bf16.mxu1 %v3668_v44 }
 0x1e9   : > { %3481 = vmatmul.mubr.msk.bf16.gmra.mrb[4].mxu1 %vm1378_vm2, %v2471_v4 }
 0x2b4   : > { %v3478_v38 = vpop.f32.mrb[0].mxu1 }
 0x2b5   : > { %v2583_v31 = vmul.f32 %v3478_v38, %v3160_v32  ;;  %v2535_v47 = vpop.f32.mrb[1].mxu1 }
 0x2b6   : > { %v2581_v30 = vmul.f32 %v3160_v32, %v2535_v47  ;;  %v3479_v19 = vpop.f32.mrb[2].mxu1 }
 0x2b7   : > { %v2598_v59 = vadd.f32 %v3161_v12, %v2583_v31  ;;  %v2584_v7 = vmul.f32 %v3479_v19, %v3160_v32  ;;  %v2538_v51 = vpop.f32.mrb[3].mxu1 }
 0x2b8   : > { %v2596_v34 = vadd.f32 %v3161_v12, %v2581_v30  ;;  %v2582_v45 = vmul.f32 %v3160_v32, %v2538_v51 }
 0x2b9   : > { %v2599_v33 = vadd.f32 %v3161_v12, %v2584_v7  ;;  %v2606_v63 = vmax.f32 %v2598_v59, 0.0 }
 0x2ba   : > { %v2597_v40 = vadd.f32 %v3161_v12, %v2582_v45  ;;  %v2604_v29 = vmax.f32 %v2596_v34, 0.0 }
 0x2bb   : > { %v2607_v60 = vmax.f32 %v2599_v33, 0.0 }
 0x2bc   : > { %v2605_v56 = vmax.f32 %v2597_v40, 0.0  ;;  %v3482_v48 = vpop.f32.mrb[4].mxu1 }
 0x2bd   : > { %v2613_v9 = vpack.c.bf16 %v2607_v60, %v2606_v63  ;;  %v2587_v13 = vmul.f32 %v3482_v48, %v3160_v32  ;;  %v2551_v41 = vpop.f32.mrb[5].mxu1 }
 0x2be   : > { %v2612_v27 = vpack.c.bf16 %v2605_v56, %v2604_v29  ;;  %v2585_v20 = vmul.f32 %v3160_v32, %v2551_v41  ;;  %v3483_v10 = vpop.f32.mrb[6].mxu1 }
 0x2bf   : > { %v2602_v39 = vadd.f32 %v3161_v12, %v2587_v13  ;;  %v2588_v37 = vmul.f32 %v3483_v10, %v3160_v32  ;;  %v2554_v61 = vpop.f32.mrb[7].mxu1 }
 0x2c0   : > { %v2600_v53 = vadd.f32 %v3161_v12, %v2585_v20  ;;  %v2586_v17 = vmul.f32 %v3160_v32, %v2554_v61  ;;  %3488 = vmatprep.mubr.msk.bf16.mxu1 %vm1378_vm2, %v2612_v27 }
 0x2c1   : > { %v2603_v54 = vadd.f32 %v3161_v12, %v2588_v37  ;;  %3489 = vmatmul.mubr.msk.bf16.vlgmr.msra.gmra.mrb[8].mxu1 %vm1378_vm2, %v2613_v9  ;;  %v2610_v35 = vmax.f32 %v2602_v39, 0.0 }
 0x2c2   : > { %v2601_v14 = vadd.f32 %v3161_v12, %v2586_v17  ;;  %3497 = vmatpush3.bf16.msra.mxu1 %v3668_v44  ;;  %v2608_v62 = vmax.f32 %v2600_v53, 0.0 }
 0x2c3   : > { %v2611_v15 = vmax.f32 %v2603_v54, 0.0  ;;  %3498 = vmatprep.subr.bf16.mxu1 %v3669_v18 }
 0x2c4   : > { %v2609_v57 = vmax.f32 %v2601_v14, 0.0 }
 0x2c5   : > { %v2615_v36 = vpack.c.bf16 %v2611_v15, %v2610_v35 }
 0x2c6   : > { %v2614_v49 = vpack.c.bf16 %v2609_v57, %v2608_v62  ;;  %3499 = vmatpush3.bf16.msra.mxu1 %v3669_v18 }
 0x2c7   : > { %3500 = vmatprep.subr.bf16.mxu1 %v3670_v55 }
 0x2c8   : > { %3492 = vmatprep.mubr.msk.bf16.mxu1 %vm1378_vm2, %v2614_v49 }
 0x2c9   : > { %3493 = vmatmul.mubr.msk.bf16.gmra.mrb[12].mxu1 %vm1378_vm2, %v2615_v36 }
 0x2ca   : > { %3501 = vmatpush3.bf16.msra.mxu1 %v3670_v55  ;;  %3504 = vmatprep.mubr.msk.bf16.mxu1 %vm690_vm1, %v3672_v25 }
 0x2cb   : > { %3502 = vmatprep.subr.bf16.mxu1 %v3671_v24 }
 0x2ce   : > { %3503 = vmatpush3.bf16.msra.mxu1 %v3671_v24 }
 0x2d1   : > { %3505 = vmatmul.mubr.msk.bf16.vlgmr.msra.gmra.mrb[16].mxu1 %vm690_vm1, %v3673_v22 }
 0x2d2   : > { %3508 = vmatprep.mubr.msk.bf16.mxu1 %vm690_vm1, %v3674_v23 }
 0x2d9   : > { %3509 = vmatmul.mubr.msk.bf16.gmra.mrb[20].mxu1 %vm690_vm1, %v3675_v11 }
 0x394   : > { %v3490_v58 = vpop.f32.mrb[8].mxu1 }
 0x395   : > { %v2678_v3 = vpop.f32.mrb[9].mxu1  ;;  %v2718_v46 = vmul.f32 %v3490_v58, %v3168_v16 }
 0x396   : > { %v3491_v8 = vpop.f32.mrb[10].mxu1  ;;  %v2716_v21 = vmul.f32 %v3168_v16, %v2678_v3 }
 0x397   : > { %v2681_v1 = vpop.f32.mrb[11].mxu1  ;;  %v2719_v5 = vmul.f32 %v3491_v8, %v3168_v16  ;;  %v2733_v12 = vadd.f32 %v3169_v43, %v2718_v46 }
 0x398   : > { %v2717_v44 = vmul.f32 %v3168_v16, %v2681_v1  ;;  %v2731_v19 = vadd.f32 %v3169_v43, %v2716_v21 }
 0x399   : > { %v2734_v51 = vadd.f32 %v3169_v43, %v2719_v5 }
 0x39a   : > { %v2732_v33 = vadd.f32 %v3169_v43, %v2717_v44 }
 0x39c   : > { %v3494_v52 = vpop.f32.mrb[12].mxu1 }
 0x39d   : > { %v2694_v0 = vpop.f32.mrb[13].mxu1  ;;  %v2722_v60 = vmul.f32 %v3494_v52, %v3168_v16 }
 0x39e   : > { %v3495_v26 = vpop.f32.mrb[14].mxu1  ;;  %v2720_v48 = vmul.f32 %v3168_v16, %v2694_v0 }
 0x39f   : > { %v2697_v50 = vpop.f32.mrb[15].mxu1  ;;  %v2723_v27 = vmul.f32 %v3495_v26, %v3168_v16  ;;  %v2737_v17 = vadd.f32 %v3169_v43, %v2722_v60 }
 0x3a0   : > { %v2721_v37 = vmul.f32 %v3168_v16, %v2697_v50  ;;  %v2735_v15 = vadd.f32 %v3169_v43, %v2720_v48 }
 0x3a1   : > { %v2738_v57 = vadd.f32 %v3169_v43, %v2723_v27 }
 0x3a2   : > { %v2736_v25 = vadd.f32 %v3169_v43, %v2721_v37 }
 0x3a4   : > { %v3506_v2 = vpop.f32.mrb[16].mxu1 }
 0x3a5   : > { %v2885_v4 = vmul.f32 %v3506_v2, %v3182_v28  ;;  %v2845_v42 = vpop.f32.mrb[17].mxu1 }
 0x3a6   : > { %v2883_v32 = vmul.f32 %v3182_v28, %v2845_v42  ;;  %v3507_v38 = vpop.f32.mrb[18].mxu1 }
 0x3a7   : > { %v2900_v31 = vadd.f32 %v3183_v6, %v2885_v4  ;;  %v2886_v47 = vmul.f32 %v3507_v38, %v3182_v28  ;;  %v2848_v30 = vpop.f32.mrb[19].mxu1 }
 0x3a8   : > { %v2898_v59 = vadd.f32 %v3183_v6, %v2883_v32  ;;  %v2884_v7 = vmul.f32 %v3182_v28, %v2848_v30 }
 0x3a9   : > { %v2908_v34 = vadd.f32 %v2900_v31, %v2733_v12  ;;  %v2901_v45 = vadd.f32 %v3183_v6, %v2886_v47 }
 0x3aa   : > { %v2906_v40 = vadd.f32 %v2898_v59, %v2731_v19  ;;  %v2899_v63 = vadd.f32 %v3183_v6, %v2884_v7 }
 0x3ab   : > { %v2916_v29 = vmax.f32 %v2908_v34, 0.0  ;;  %v2909_v56 = vadd.f32 %v2901_v45, %v2734_v51 }
 0x3ac   : > { %v2914_v9 = vmax.f32 %v2906_v40, 0.0  ;;  %v2907_v13 = vadd.f32 %v2899_v63, %v2732_v33  ;;  %v3510_v41 = vpop.f32.mrb[20].mxu1 }
 0x3ad   : > { %2924 = vst [vmem:[%s4708_s24 + $0x10] sm:$0xff] %v2916_v29  ;;  %v2917_v20 = vmax.f32 %v2909_v56, 0.0  ;;  %v2889_v10 = vmul.f32 %v3510_v41, %v3182_v28  ;;  %v2861_v39 = vpop.f32.mrb[21].mxu1 }
 0x3ae   : > { %2922 = vst [vmem:[%s4708_s24] sm:$0xff] %v2914_v9  ;;  %v2915_v61 = vmax.f32 %v2907_v13, 0.0  ;;  %v2887_v18 = vmul.f32 %v3182_v28, %v2861_v39  ;;  %v3511_v53 = vpop.f32.mrb[22].mxu1 }
 0x3af   : > { %2925 = vst [vmem:[%s4708_s24 + $0x18] sm:$0xff] %v2917_v20  ;;  %v2904_v54 = vadd.f32 %v3183_v6, %v2889_v10  ;;  %v2890_v14 = vmul.f32 %v3511_v53, %v3182_v28  ;;  %v2864_v35 = vpop.f32.mrb[23].mxu1 }
 0x3b0   : > { %2923 = vst [vmem:[%s4708_s24 + $0x8] sm:$0xff] %v2915_v61  ;;  %v2902_v55 = vadd.f32 %v3183_v6, %v2887_v18  ;;  %v2888_v62 = vmul.f32 %v3182_v28, %v2864_v35 }
 0x3b1   : > { %v2912_v36 = vadd.f32 %v2904_v54, %v2737_v17  ;;  %v2905_v49 = vadd.f32 %v3183_v6, %v2890_v14 }
 0x3b2   : > { %v2910_v24 = vadd.f32 %v2902_v55, %v2735_v15  ;;  %v2903_v22 = vadd.f32 %v3183_v6, %v2888_v62 }
 0x3b3   : > { %v2920_v23 = vmax.f32 %v2912_v36, 0.0  ;;  %v2913_v11 = vadd.f32 %v2905_v49, %v2738_v57 }
 0x3b4   : > { %v2918_v58 = vmax.f32 %v2910_v24, 0.0  ;;  %v2911_v3 = vadd.f32 %v2903_v22, %v2736_v25 }
 0x3b5   : > { %2928 = vst [vmem:[%s4708_s24 + $0x30] sm:$0xff] %v2920_v23  ;;  %v2921_v8 = vmax.f32 %v2913_v11, 0.0 }
 0x3b6   : > { %2926 = vst [vmem:[%s4708_s24 + $0x20] sm:$0xff] %v2918_v58  ;;  %v2919_v1 = vmax.f32 %v2911_v3, 0.0 }
 0x3b7   : > { %2929 = vst [vmem:[%s4708_s24 + $0x38] sm:$0xff] %v2921_v8 }
 0x3b8   : > { %2927 = vst [vmem:[%s4708_s24 + $0x28] sm:$0xff] %v2919_v1 }
 0x3b9   : > { %3689 = shalt.err (!%p3686_p3)
}
 0x3ba   : > { %s3690_s18 = scalar_lea.hbm %s4720_s26, 1024  ;;  %s3694_s30 = scalar_lea.hbm %s4785_s15, 2048 }
 0x3bb   : > { %p3691_p4 = scmp.ne.s32.totalorder %s4720_s26, %s3690_s18  ;;  %p3695_p9 = scmp.lt.u32.totalorder %s4720_s26, %s4785_s15 }
 0x3bc   : > { %p3696_p10 = scmp.lt.u32.totalorder %s3694_s30, %s3690_s18  ;;  %p3698_p12 = scmp.lt.u32.totalorder %s3690_s18, %s4720_s26 }
 0x3bd   : > { %p3692_p7 = pnand %p3691_p4, %p3864_p5 }
 0x3be   : > { %p3697_p11 = por %p3696_p10, %p3695_p9 }
 0x3bf   : > { %p3693_p8 = pneg %p3692_p7 }
 0x3c0   : > { %p3699_p13 = por %p3698_p12, %p3697_p11 }
 0x3c2   : > { %p3700_p0 = pnand %p3699_p13, %p3693_p8 }
 0x3c4   : > { %3703 = shalt.err (!%p3700_p0)
}
 0x3c5   : > { %s3744_s25 = smov 128   ;;  %s3745_s20 = smov 8  }
 0x3c6   : > { %3577 = dma.vmem_to_hbm [thread:$0]  (%p3864_p5), %s4722_s23, 1024, %s4720_s26, %s4729_s22, %s3744_s25, %s3744_s25, %s3745_s20  }
 0x3c7 PF: > { %s4798_s27 = sld [smem:[#allocation7_spill]]  ;;  %p3583_p1 = scmp.ge.s32.totalorder %s3738_s21, 2 }
 0x3c9   : > { %p3580_p2 = pnand %p3583_p1, %p3868_p6 }
 0x3cd   : > { %s2959_s29 = sand.u32 1, %s4798_s27  }
 0x3ce   : > { %s2960_s18 = scalar_lea.sflag [#allocation5], %s2959_s29 }
 0x3cf   : > { %3721 = dma.done.wait (!%p3580_p2), %s2960_s18, 1024  }
 0x3d0   : > { %3723 = vsyncadd (!%p3580_p2), %s2960_s18, 4294966272  ;;  %s4800_s21 = sld [smem:[#allocation9_spill]]  ;;  %s4801_s30 = sld [smem:[#allocation8_spill]] }
 0x3d1   : > { %s4802_s20 = sld [smem:[#allocation10_spill]]  ;;  %s4803_s18 = smov %s3730_s19 }
 0x3d6   : > { %p25_p3 = scmp.ge.s32.totalorder %s4800_s21, 4   ;;  %s4804_s19 = smov %s4801_s30 }
 0x3d8   :  { %27 = sbr.rel (!%p25_p3) target bundleno = 3 (0x3), region = 126 }
 0x3df   :  { %2965 = vsyncpa [#allocation5], 1 }
 0x3e0   :  { %2967 = vsyncpa [#allocation5 + $0x1], 1 }

</bundles_post_ra>
